<compile_context>
chip_gen: v5e
topology: v5e:2x2
jax: 0.10.0
libtpu: 0.0.40
codegen_flags: <defaults>
</compile_context>

<pallas_src>
import math
import functools

import jax
import jax.numpy as jnp
import numpy as np
from jax.experimental import pallas as pl
from jax.experimental.pallas import tpu as pltpu


def _attblock_kernel(nhead, head_dim, eps,
                     src_ref, trg_ref, keep_ref,
                     wq_ref, bq_ref, wkv_ref, bkv_ref,
                     wo_ref, bo_ref, w1_ref, b1_ref, w2_ref, b2_ref,
                     g1_ref, be1_ref, g2_ref, be2_ref,
                     out_src_ref, out_attn_ref):
    """One grid step == TB batch elements; dense layers run on (TB*L, D) slabs."""
    TB, Lq, D = src_ref.shape
    Lk = trg_ref.shape[1]

    src2d = src_ref[...].reshape(TB * Lq, D)                  # f32 residual stream
    src_bf = src2d.astype(jnp.bfloat16)
    trg_bf = trg_ref[...].reshape(TB * Lk, D).astype(jnp.bfloat16)

    # ---- fused projections: bf16 MXU inputs, f32 accumulation ---------------
    # Wq / bq already carry the 1/sqrt(head_dim) attention scale (folded in the
    # wrapper), so no per-head scaling is needed below.
    qp = jnp.dot(src_bf, wq_ref[...], preferred_element_type=jnp.float32) + bq_ref[...]
    kvp = jnp.dot(trg_bf, wkv_ref[...], preferred_element_type=jnp.float32) + bkv_ref[...]

    # ---- additive key-padding bias, computed & broadcast once ---------------
    # keep: 1.0 = valid key, 0.0 = padded key.  Finite -1e30 (not -inf) so
    # fully-masked rows yield uniform weights instead of NaN.
    bias = jnp.broadcast_to((keep_ref[...] - 1.0) * 1e30, (TB, Lq, Lk))

    # ---- per-head attention; out_proj folded into the loop (no lane concat) --
    attn_acc = None                                           # out_proj accumulator
    attn_sum = None                                           # head-summed probs (f32)
    for h in range(nhead):
        lo = h * head_dim
        qh = qp[:, lo:lo + head_dim].reshape(TB, Lq, head_dim)
        kh = kvp[:, lo:lo + head_dim].reshape(TB, Lk, head_dim)
        vh = kvp[:, D + lo:D + lo + head_dim].reshape(TB, Lk, head_dim)

        s = jnp.einsum('bqd,bkd->bqk', qh.astype(jnp.bfloat16),
                       kh.astype(jnp.bfloat16),
                       preferred_element_type=jnp.float32) + bias
        m = jnp.max(s, axis=-1, keepdims=True)
        e = jnp.exp(s - m)                                    # f32 softmax
        p = e * pl.reciprocal(jnp.sum(e, axis=-1, keepdims=True), approx=True)
        attn_sum = p if attn_sum is None else attn_sum + p

        ctx_h = jnp.einsum('bqk,bkd->bqd', p.astype(jnp.bfloat16),
                           vh.astype(jnp.bfloat16),
                           preferred_element_type=jnp.float32)
        # fold out_proj: attn_out += ctx_h @ W_o[h*hd:(h+1)*hd, :]
        contrib = jnp.dot(ctx_h.reshape(TB * Lq, head_dim).astype(jnp.bfloat16),
                          wo_ref[h], preferred_element_type=jnp.float32)
        attn_acc = contrib if attn_acc is None else attn_acc + contrib

    # ---- out_proj bias + residual + LayerNorm1 (f32) -------------------------
    x = src2d + attn_acc + bo_ref[...]
    mu = jnp.mean(x, axis=-1, keepdims=True)
    xc = x - mu
    var = jnp.mean(xc * xc, axis=-1, keepdims=True)
    x = xc * jax.lax.rsqrt(var + eps) * g1_ref[...] + be1_ref[...]

    # ---- feed-forward (relu) + residual + LayerNorm2 --------------------------
    h1 = jnp.maximum(
        jnp.dot(x.astype(jnp.bfloat16), w1_ref[...],
                preferred_element_type=jnp.float32) + b1_ref[...], 0.0)
    ff = jnp.dot(h1.astype(jnp.bfloat16), w2_ref[...],
                 preferred_element_type=jnp.float32) + b2_ref[...]
    y = x + ff
    mu2 = jnp.mean(y, axis=-1, keepdims=True)
    yc = y - mu2
    var2 = jnp.mean(yc * yc, axis=-1, keepdims=True)
    y = yc * jax.lax.rsqrt(var2 + eps) * g2_ref[...] + be2_ref[...]

    # NOTE: for production sizes pad D / Lk to multiples of 128 so these stores
    # are lane-dense (unmasked vst); module output shapes are kept as-is here.
    out_src_ref[...] = y.reshape(TB, Lq, D)
    out_attn_ref[...] = attn_sum * (1.0 / nhead)              # head-averaged weights


def attblock_pallas(src, trg, src_mask, params, nhead, *, batch_tile=None):
    B, Lq, D = src.shape
    Lk = trg.shape[1]
    head_dim = D // nhead
    scale = 1.0 / math.sqrt(head_dim)
    f32, bf16 = jnp.float32, jnp.bfloat16

    # Batch-tile: process TB batch elements per grid step so the dense layers
    # see a well-filled MXU M axis (also amortizes per-step pipeline overhead).
    if batch_tile is None:
        row_cap = 512
        batch_tile = 1
        for tb in range(B, 0, -1):
            if B % tb == 0 and tb * max(Lq, Lk) <= max(row_cap, max(Lq, Lk)):
                batch_tile = tb
                break
    TB = batch_tile
    assert B % TB == 0

    keep = src_mask.astype(f32).reshape(B, 1, Lk)             # 1 = valid key

    # bf16 weights for the MXU (halves VMEM / DMA bytes); biases & LN in f32.
    # The attention scale is folded into Wq / bq here (one-time weight prep).
    weights = [
        (params['wq'] * scale).astype(bf16),
        (params['bq'] * scale).astype(f32),
        jnp.concatenate([params['wk'], params['wv']], axis=1).astype(bf16),   # (D, 2D)
        jnp.concatenate([params['bk'], params['bv']], axis=1).astype(f32),    # (1, 2D)
        params['wo'].reshape(nhead, head_dim, D).astype(bf16),                # per-head rows
        params['bo'].astype(f32),
        params['w1'].astype(bf16),
        params['b1'].astype(f32),
        params['w2'].astype(bf16),
        params['b2'].astype(f32),
        params['g1'].astype(f32), params['be1'].astype(f32),
        params['g2'].astype(f32), params['be2'].astype(f32),
    ]

    def full_spec(arr):
        nd = arr.ndim
        return pl.BlockSpec(arr.shape, lambda b, _nd=nd: (0,) * _nd)

    in_specs = [
        pl.BlockSpec((TB, Lq, D), lambda b: (b, 0, 0)),
        pl.BlockSpec((TB, Lk, D), lambda b: (b, 0, 0)),
        pl.BlockSpec((TB, 1, Lk), lambda b: (b, 0, 0)),
    ] + [full_spec(w) for w in weights]

    out_specs = (
        pl.BlockSpec((TB, Lq, D), lambda b: (b, 0, 0)),
        pl.BlockSpec((TB, Lq, Lk), lambda b: (b, 0, 0)),
    )
    out_shape = (
        jax.ShapeDtypeStruct((B, Lq, D), f32),
        jax.ShapeDtypeStruct((B, Lq, Lk), f32),
    )

    # Explicit VMEM budget: the pipeline double-buffers every block, so size 2x.
    block_bytes = 4 * (TB * Lq * D + TB * Lk * D + TB * Lk + TB * Lq * D + TB * Lq * Lk)
    weight_bytes = sum(int(w.size) * w.dtype.itemsize for w in weights)
    vmem_limit = int(min(64 << 20,
                         max(32 << 20, 2 * (block_bytes + weight_bytes) + (4 << 20))))

    kernel = functools.partial(_attblock_kernel, nhead, head_dim, 1e-5)
    return pl.pallas_call(
        kernel,
        grid=(B // TB,),
        in_specs=in_specs,
        out_specs=out_specs,
        out_shape=out_shape,
        compiler_params=pltpu.CompilerParams(
            # batch tiles are independent -> shard across TensorCores on v7x
            dimension_semantics=("parallel",),
            vmem_limit_bytes=vmem_limit,
        ),
    )(src, trg, keep, *weights)


def init_params(key, d_model, dim_feedforward):
    ks = jax.random.split(key, 12)
    s = 0.05
    n = lambda k, shape: (jax.random.normal(k, shape, jnp.float32) * s)
    return {
        'wq': n(ks[0], (d_model, d_model)),  'bq': n(ks[1], (1, d_model)),
        'wk': n(ks[2], (d_model, d_model)),  'bk': n(ks[3], (1, d_model)),
        'wv': n(ks[4], (d_model, d_model)),  'bv': n(ks[5], (1, d_model)),
        'wo': n(ks[6], (d_model, d_model)),  'bo': n(ks[7], (1, d_model)),
        'w1': n(ks[8], (d_model, dim_feedforward)), 'b1': n(ks[9], (1, dim_feedforward)),
        'w2': n(ks[10], (dim_feedforward, d_model)), 'b2': n(ks[11], (1, d_model)),
        'g1': jnp.ones((1, d_model), jnp.float32), 'be1': jnp.zeros((1, d_model), jnp.float32),
        'g2': jnp.ones((1, d_model), jnp.float32), 'be2': jnp.zeros((1, d_model), jnp.float32),
    }


def ref_forward(src, trg, src_mask, p, nhead):
    """Pure-JAX f32 reference (same math as PyTorch Attblock in eval mode)."""
    B, Lq, D = src.shape
    Lk = trg.shape[1]
    hd = D // nhead
    scale = 1.0 / math.sqrt(hd)
    qp = src @ p['wq'] + p['bq']
    kp = trg @ p['wk'] + p['bk']
    vp = trg @ p['wv'] + p['bv']
    qh = qp.reshape(B, Lq, nhead, hd).transpose(0, 2, 1, 3) * scale
    kh = kp.reshape(B, Lk, nhead, hd).transpose(0, 2, 1, 3)
    vh = vp.reshape(B, Lk, nhead, hd).transpose(0, 2, 1, 3)
    s = jnp.einsum('bhqd,bhkd->bhqk', qh, kh)
    s = jnp.where(src_mask[:, None, None, :], s, -jnp.inf)
    w = jax.nn.softmax(s, axis=-1)
    ctx = jnp.einsum('bhqk,bhkd->bhqd', w, vh).transpose(0, 2, 1, 3).reshape(B, Lq, D)
    attn_avg = w.mean(axis=1)

    def ln(v, g, b):
        mu = v.mean(-1, keepdims=True)
        var = ((v - mu) ** 2).mean(-1, keepdims=True)
        return (v - mu) / jnp.sqrt(var + 1e-5) * g + b

    x = ln(src + ctx @ p['wo'] + p['bo'], p['g1'], p['be1'])
    ff = jnp.maximum(x @ p['w1'] + p['b1'], 0.0) @ p['w2'] + p['b2']
    x = ln(x + ff, p['g2'], p['be2'])
    return x, attn_avg


if __name__ == "__main__":
    B, Lq, Lk, D, NHEAD, DFF = 2, 8, 8, 32, 4, 64
    key = jax.random.PRNGKey(0)
    k_src, k_trg, k_param = jax.random.split(key, 3)

    src = jax.random.normal(k_src, (B, Lq, D), jnp.float32)
    trg = jax.random.normal(k_trg, (B, Lk, D), jnp.float32)
    # src_mask: True = valid key (the module inverts it into a key_padding_mask);
    # last 2 keys of every batch are padded out.
    src_mask = jnp.concatenate(
        [jnp.ones((B, Lk - 2), dtype=bool), jnp.zeros((B, 2), dtype=bool)], axis=1)

    params = init_params(k_param, D, DFF)

    out, attn = attblock_pallas(src, trg, src_mask, params, NHEAD)
    jax.block_until_ready((out, attn))

    ref_out, ref_attn = ref_forward(src, trg, src_mask, params, NHEAD)
    # Tolerance covers intentional bf16 MXU operands + EUP approx reciprocal
    # in the kernel vs. the pure-f32 reference.
    assert np.allclose(np.asarray(out), np.asarray(ref_out), atol=2e-2, rtol=2e-2)
    assert np.allclose(np.asarray(attn), np.asarray(ref_attn), atol=2e-2, rtol=2e-2)

    print("KERNEL_OK")
</pallas_src>

<mosaic_0001>
module attributes {stable_mosaic.version = 11 : i64} {
  func.func @_attblock_kernel(%arg0: i32, %arg1: memref<2x8x32xf32, #tpu.memory_space<vmem>>, %arg2: memref<2x8x32xf32, #tpu.memory_space<vmem>>, %arg3: memref<2x1x8xf32, #tpu.memory_space<vmem>>, %arg4: memref<32x32xbf16, #tpu.memory_space<vmem>>, %arg5: memref<1x32xf32, #tpu.memory_space<vmem>>, %arg6: memref<32x64xbf16, #tpu.memory_space<vmem>>, %arg7: memref<1x64xf32, #tpu.memory_space<vmem>>, %arg8: memref<4x8x32xbf16, #tpu.memory_space<vmem>>, %arg9: memref<1x32xf32, #tpu.memory_space<vmem>>, %arg10: memref<32x64xbf16, #tpu.memory_space<vmem>>, %arg11: memref<1x64xf32, #tpu.memory_space<vmem>>, %arg12: memref<64x32xbf16, #tpu.memory_space<vmem>>, %arg13: memref<1x32xf32, #tpu.memory_space<vmem>>, %arg14: memref<1x32xf32, #tpu.memory_space<vmem>>, %arg15: memref<1x32xf32, #tpu.memory_space<vmem>>, %arg16: memref<1x32xf32, #tpu.memory_space<vmem>>, %arg17: memref<1x32xf32, #tpu.memory_space<vmem>>, %arg18: memref<2x8x32xf32, #tpu.memory_space<vmem>>, %arg19: memref<2x8x8xf32, #tpu.memory_space<vmem>>) attributes {dimension_semantics = [#tpu.dimension_semantics<parallel>], iteration_bounds = array<i64: 1>, scalar_prefetch = 0 : i64, scratch_operands = 0 : i64, tpu.core_type = #tpu.core_type<tc>, window_params = [{transform_indices = @transform_0, window_bounds = array<i64: 2, 8, 32>}, {transform_indices = @transform_1, window_bounds = array<i64: 2, 8, 32>}, {transform_indices = @transform_2, window_bounds = array<i64: 2, 1, 8>}, {pipeline_mode = #tpu.pipeline_mode<synchronous>, transform_indices = @transform_3, window_bounds = array<i64: 32, 32>}, {pipeline_mode = #tpu.pipeline_mode<synchronous>, transform_indices = @transform_4, window_bounds = array<i64: 1, 32>}, {pipeline_mode = #tpu.pipeline_mode<synchronous>, transform_indices = @transform_5, window_bounds = array<i64: 32, 64>}, {pipeline_mode = #tpu.pipeline_mode<synchronous>, transform_indices = @transform_6, window_bounds = array<i64: 1, 64>}, {pipeline_mode = #tpu.pipeline_mode<synchronous>, transform_indices = @transform_7, window_bounds = array<i64: 4, 8, 32>}, {pipeline_mode = #tpu.pipeline_mode<synchronous>, transform_indices = @transform_8, window_bounds = array<i64: 1, 32>}, {pipeline_mode = #tpu.pipeline_mode<synchronous>, transform_indices = @transform_9, window_bounds = array<i64: 32, 64>}, {pipeline_mode = #tpu.pipeline_mode<synchronous>, transform_indices = @transform_10, window_bounds = array<i64: 1, 64>}, {pipeline_mode = #tpu.pipeline_mode<synchronous>, transform_indices = @transform_11, window_bounds = array<i64: 64, 32>}, {pipeline_mode = #tpu.pipeline_mode<synchronous>, transform_indices = @transform_12, window_bounds = array<i64: 1, 32>}, {pipeline_mode = #tpu.pipeline_mode<synchronous>, transform_indices = @transform_13, window_bounds = array<i64: 1, 32>}, {pipeline_mode = #tpu.pipeline_mode<synchronous>, transform_indices = @transform_14, window_bounds = array<i64: 1, 32>}, {pipeline_mode = #tpu.pipeline_mode<synchronous>, transform_indices = @transform_15, window_bounds = array<i64: 1, 32>}, {pipeline_mode = #tpu.pipeline_mode<synchronous>, transform_indices = @transform_16, window_bounds = array<i64: 1, 32>}, {transform_indices = @transform_17, window_bounds = array<i64: 2, 8, 32>}, {transform_indices = @transform_18, window_bounds = array<i64: 2, 8, 8>}]} {
    %c0 = arith.constant 0 : index
    %c0_0 = arith.constant 0 : index
    %c0_1 = arith.constant 0 : index
    %0 = vector.load %arg1[%c0, %c0_0, %c0_1] : memref<2x8x32xf32, #tpu.memory_space<vmem>>, vector<2x8x32xf32>
    %1 = vector.shape_cast %0 : vector<2x8x32xf32> to vector<16x32xf32>
    %2 = arith.truncf %1 : vector<16x32xf32> to vector<16x32xbf16>
    %c0_2 = arith.constant 0 : index
    %c0_3 = arith.constant 0 : index
    %c0_4 = arith.constant 0 : index
    %3 = vector.load %arg2[%c0_2, %c0_3, %c0_4] : memref<2x8x32xf32, #tpu.memory_space<vmem>>, vector<2x8x32xf32>
    %4 = vector.shape_cast %3 : vector<2x8x32xf32> to vector<16x32xf32>
    %5 = arith.truncf %4 : vector<16x32xf32> to vector<16x32xbf16>
    %c0_5 = arith.constant 0 : index
    %c0_6 = arith.constant 0 : index
    %6 = vector.load %arg4[%c0_5, %c0_6] : memref<32x32xbf16, #tpu.memory_space<vmem>>, vector<32x32xbf16>
    %cst = arith.constant dense<0.000000e+00> : vector<16x32xf32>
    %7 = tpu.matmul %2, %6, %cst {dimension_numbers = #tpu.dot_dimension_numbers<[1], [0], [0], [1], [0, 0, 1, 1], [], []>} : vector<16x32xbf16>, vector<32x32xbf16>, vector<16x32xf32> -> vector<16x32xf32>
    %c0_7 = arith.constant 0 : index
    %c0_8 = arith.constant 0 : index
    %8 = vector.load %arg5[%c0_7, %c0_8] : memref<1x32xf32, #tpu.memory_space<vmem>>, vector<1x32xf32>
    %9 = vector.broadcast %8 : vector<1x32xf32> to vector<16x32xf32>
    %10 = arith.addf %7, %9 : vector<16x32xf32>
    %c0_9 = arith.constant 0 : index
    %c0_10 = arith.constant 0 : index
    %11 = vector.load %arg6[%c0_9, %c0_10] : memref<32x64xbf16, #tpu.memory_space<vmem>>, vector<32x64xbf16>
    %cst_11 = arith.constant dense<0.000000e+00> : vector<16x64xf32>
    %12 = tpu.matmul %5, %11, %cst_11 {dimension_numbers = #tpu.dot_dimension_numbers<[1], [0], [0], [1], [0, 0, 1, 1], [], []>} : vector<16x32xbf16>, vector<32x64xbf16>, vector<16x64xf32> -> vector<16x64xf32>
    %c0_12 = arith.constant 0 : index
    %c0_13 = arith.constant 0 : index
    %13 = vector.load %arg7[%c0_12, %c0_13] : memref<1x64xf32, #tpu.memory_space<vmem>>, vector<1x64xf32>
    %14 = vector.broadcast %13 : vector<1x64xf32> to vector<16x64xf32>
    %15 = arith.addf %12, %14 : vector<16x64xf32>
    %c0_14 = arith.constant 0 : index
    %c0_15 = arith.constant 0 : index
    %c0_16 = arith.constant 0 : index
    %16 = vector.load %arg3[%c0_14, %c0_15, %c0_16] : memref<2x1x8xf32, #tpu.memory_space<vmem>>, vector<2x1x8xf32>
    %cst_17 = arith.constant 1.000000e+00 : f32
    %17 = vector.broadcast %cst_17 : f32 to vector<2x1x8xf32>
    %18 = arith.subf %16, %17 : vector<2x1x8xf32>
    %cst_18 = arith.constant 1.000000e+30 : f32
    %19 = vector.broadcast %cst_18 : f32 to vector<2x1x8xf32>
    %20 = arith.mulf %18, %19 : vector<2x1x8xf32>
    %21 = vector.shape_cast %20 : vector<2x1x8xf32> to vector<2x1x8xf32>
    %22 = vector.broadcast %21 : vector<2x1x8xf32> to vector<2x8x8xf32>
    %23 = vector.extract_strided_slice %10 {offsets = [0, 0], sizes = [16, 8], strides = [1, 1]} : vector<16x32xf32> to vector<16x8xf32>
    %24 = vector.shape_cast %23 : vector<16x8xf32> to vector<2x8x8xf32>
    %25 = vector.extract_strided_slice %15 {offsets = [0, 0], sizes = [16, 8], strides = [1, 1]} : vector<16x64xf32> to vector<16x8xf32>
    %26 = vector.shape_cast %25 : vector<16x8xf32> to vector<2x8x8xf32>
    %27 = vector.extract_strided_slice %15 {offsets = [0, 32], sizes = [16, 8], strides = [1, 1]} : vector<16x64xf32> to vector<16x8xf32>
    %28 = vector.shape_cast %27 : vector<16x8xf32> to vector<2x8x8xf32>
    %29 = arith.truncf %24 : vector<2x8x8xf32> to vector<2x8x8xbf16>
    %30 = arith.truncf %26 : vector<2x8x8xf32> to vector<2x8x8xbf16>
    "tpu.trace_start"() <{level = 10 : i32, message = "bqd,bkd->bqk"}> : () -> ()
    %cst_19 = arith.constant dense<0.000000e+00> : vector<2x8x8xf32>
    %31 = tpu.matmul %29, %30, %cst_19 {dimension_numbers = #tpu.dot_dimension_numbers<[2], [2], [1], [1], [0, 0, 0, 1, 1, 1], [0], [0]>} : vector<2x8x8xbf16>, vector<2x8x8xbf16>, vector<2x8x8xf32> -> vector<2x8x8xf32>
    "tpu.trace_stop"() : () -> ()
    %32 = arith.addf %31, %22 : vector<2x8x8xf32>
    %cst_20 = arith.constant dense<0xFF800000> : vector<2x8xf32>
    %33 = vector.multi_reduction <maximumf>, %32, %cst_20 [2] : vector<2x8x8xf32> to vector<2x8xf32>
    %34 = vector.shape_cast %33 : vector<2x8xf32> to vector<2x8x1xf32>
    %35 = vector.broadcast %34 : vector<2x8x1xf32> to vector<2x8x8xf32>
    %36 = arith.subf %32, %35 : vector<2x8x8xf32>
    %37 = math.exp %36 : vector<2x8x8xf32>
    %cst_21 = arith.constant dense<0.000000e+00> : vector<2x8xf32>
    %38 = vector.multi_reduction <add>, %37, %cst_21 [2] : vector<2x8x8xf32> to vector<2x8xf32>
    %39 = vector.shape_cast %38 : vector<2x8xf32> to vector<2x8x1xf32>
    %40 = tpu.reciprocal %39 {approx = true} : vector<2x8x1xf32> -> vector<2x8x1xf32>
    %41 = vector.broadcast %40 : vector<2x8x1xf32> to vector<2x8x8xf32>
    %42 = arith.mulf %37, %41 : vector<2x8x8xf32>
    %43 = arith.truncf %42 : vector<2x8x8xf32> to vector<2x8x8xbf16>
    %44 = arith.truncf %28 : vector<2x8x8xf32> to vector<2x8x8xbf16>
    "tpu.trace_start"() <{level = 10 : i32, message = "bqk,bkd->bqd"}> : () -> ()
    %cst_22 = arith.constant dense<0.000000e+00> : vector<2x8x8xf32>
    %45 = tpu.matmul %43, %44, %cst_22 {dimension_numbers = #tpu.dot_dimension_numbers<[2], [1], [1], [2], [0, 0, 0, 1, 1, 2], [0], [0]>} : vector<2x8x8xbf16>, vector<2x8x8xbf16>, vector<2x8x8xf32> -> vector<2x8x8xf32>
    "tpu.trace_stop"() : () -> ()
    %46 = vector.shape_cast %45 : vector<2x8x8xf32> to vector<16x8xf32>
    %47 = arith.truncf %46 : vector<16x8xf32> to vector<16x8xbf16>
    %c0_23 = arith.constant 0 : index
    %c0_24 = arith.constant 0 : index
    %c0_25 = arith.constant 0 : index
    %48 = vector.load %arg8[%c0_23, %c0_24, %c0_25] : memref<4x8x32xbf16, #tpu.memory_space<vmem>>, vector<1x8x32xbf16>
    %49 = vector.shape_cast %48 : vector<1x8x32xbf16> to vector<8x32xbf16>
    %cst_26 = arith.constant dense<0.000000e+00> : vector<16x32xf32>
    %50 = tpu.matmul %47, %49, %cst_26 {dimension_numbers = #tpu.dot_dimension_numbers<[1], [0], [0], [1], [0, 0, 1, 1], [], []>} : vector<16x8xbf16>, vector<8x32xbf16>, vector<16x32xf32> -> vector<16x32xf32>
    %51 = vector.extract_strided_slice %10 {offsets = [0, 8], sizes = [16, 8], strides = [1, 1]} : vector<16x32xf32> to vector<16x8xf32>
    %52 = vector.shape_cast %51 : vector<16x8xf32> to vector<2x8x8xf32>
    %53 = vector.extract_strided_slice %15 {offsets = [0, 8], sizes = [16, 8], strides = [1, 1]} : vector<16x64xf32> to vector<16x8xf32>
    %54 = vector.shape_cast %53 : vector<16x8xf32> to vector<2x8x8xf32>
    %55 = vector.extract_strided_slice %15 {offsets = [0, 40], sizes = [16, 8], strides = [1, 1]} : vector<16x64xf32> to vector<16x8xf32>
    %56 = vector.shape_cast %55 : vector<16x8xf32> to vector<2x8x8xf32>
    %57 = arith.truncf %52 : vector<2x8x8xf32> to vector<2x8x8xbf16>
    %58 = arith.truncf %54 : vector<2x8x8xf32> to vector<2x8x8xbf16>
    "tpu.trace_start"() <{level = 10 : i32, message = "bqd,bkd->bqk"}> : () -> ()
    %cst_27 = arith.constant dense<0.000000e+00> : vector<2x8x8xf32>
    %59 = tpu.matmul %57, %58, %cst_27 {dimension_numbers = #tpu.dot_dimension_numbers<[2], [2], [1], [1], [0, 0, 0, 1, 1, 1], [0], [0]>} : vector<2x8x8xbf16>, vector<2x8x8xbf16>, vector<2x8x8xf32> -> vector<2x8x8xf32>
    "tpu.trace_stop"() : () -> ()
    %60 = arith.addf %59, %22 : vector<2x8x8xf32>
    %cst_28 = arith.constant dense<0xFF800000> : vector<2x8xf32>
    %61 = vector.multi_reduction <maximumf>, %60, %cst_28 [2] : vector<2x8x8xf32> to vector<2x8xf32>
    %62 = vector.shape_cast %61 : vector<2x8xf32> to vector<2x8x1xf32>
    %63 = vector.broadcast %62 : vector<2x8x1xf32> to vector<2x8x8xf32>
    %64 = arith.subf %60, %63 : vector<2x8x8xf32>
    %65 = math.exp %64 : vector<2x8x8xf32>
    %cst_29 = arith.constant dense<0.000000e+00> : vector<2x8xf32>
    %66 = vector.multi_reduction <add>, %65, %cst_29 [2] : vector<2x8x8xf32> to vector<2x8xf32>
    %67 = vector.shape_cast %66 : vector<2x8xf32> to vector<2x8x1xf32>
    %68 = tpu.reciprocal %67 {approx = true} : vector<2x8x1xf32> -> vector<2x8x1xf32>
    %69 = vector.broadcast %68 : vector<2x8x1xf32> to vector<2x8x8xf32>
    %70 = arith.mulf %65, %69 : vector<2x8x8xf32>
    %71 = arith.addf %42, %70 : vector<2x8x8xf32>
    %72 = arith.truncf %70 : vector<2x8x8xf32> to vector<2x8x8xbf16>
    %73 = arith.truncf %56 : vector<2x8x8xf32> to vector<2x8x8xbf16>
    "tpu.trace_start"() <{level = 10 : i32, message = "bqk,bkd->bqd"}> : () -> ()
    %cst_30 = arith.constant dense<0.000000e+00> : vector<2x8x8xf32>
    %74 = tpu.matmul %72, %73, %cst_30 {dimension_numbers = #tpu.dot_dimension_numbers<[2], [1], [1], [2], [0, 0, 0, 1, 1, 2], [0], [0]>} : vector<2x8x8xbf16>, vector<2x8x8xbf16>, vector<2x8x8xf32> -> vector<2x8x8xf32>
    "tpu.trace_stop"() : () -> ()
    %75 = vector.shape_cast %74 : vector<2x8x8xf32> to vector<16x8xf32>
    %76 = arith.truncf %75 : vector<16x8xf32> to vector<16x8xbf16>
    %c1 = arith.constant 1 : index
    %c0_31 = arith.constant 0 : index
    %c0_32 = arith.constant 0 : index
    %77 = vector.load %arg8[%c1, %c0_31, %c0_32] : memref<4x8x32xbf16, #tpu.memory_space<vmem>>, vector<1x8x32xbf16>
    %78 = vector.shape_cast %77 : vector<1x8x32xbf16> to vector<8x32xbf16>
    %cst_33 = arith.constant dense<0.000000e+00> : vector<16x32xf32>
    %79 = tpu.matmul %76, %78, %cst_33 {dimension_numbers = #tpu.dot_dimension_numbers<[1], [0], [0], [1], [0, 0, 1, 1], [], []>} : vector<16x8xbf16>, vector<8x32xbf16>, vector<16x32xf32> -> vector<16x32xf32>
    %80 = arith.addf %50, %79 : vector<16x32xf32>
    %81 = vector.extract_strided_slice %10 {offsets = [0, 16], sizes = [16, 8], strides = [1, 1]} : vector<16x32xf32> to vector<16x8xf32>
    %82 = vector.shape_cast %81 : vector<16x8xf32> to vector<2x8x8xf32>
    %83 = vector.extract_strided_slice %15 {offsets = [0, 16], sizes = [16, 8], strides = [1, 1]} : vector<16x64xf32> to vector<16x8xf32>
    %84 = vector.shape_cast %83 : vector<16x8xf32> to vector<2x8x8xf32>
    %85 = vector.extract_strided_slice %15 {offsets = [0, 48], sizes = [16, 8], strides = [1, 1]} : vector<16x64xf32> to vector<16x8xf32>
    %86 = vector.shape_cast %85 : vector<16x8xf32> to vector<2x8x8xf32>
    %87 = arith.truncf %82 : vector<2x8x8xf32> to vector<2x8x8xbf16>
    %88 = arith.truncf %84 : vector<2x8x8xf32> to vector<2x8x8xbf16>
    "tpu.trace_start"() <{level = 10 : i32, message = "bqd,bkd->bqk"}> : () -> ()
    %cst_34 = arith.constant dense<0.000000e+00> : vector<2x8x8xf32>
    %89 = tpu.matmul %87, %88, %cst_34 {dimension_numbers = #tpu.dot_dimension_numbers<[2], [2], [1], [1], [0, 0, 0, 1, 1, 1], [0], [0]>} : vector<2x8x8xbf16>, vector<2x8x8xbf16>, vector<2x8x8xf32> -> vector<2x8x8xf32>
    "tpu.trace_stop"() : () -> ()
    %90 = arith.addf %89, %22 : vector<2x8x8xf32>
    %cst_35 = arith.constant dense<0xFF800000> : vector<2x8xf32>
    %91 = vector.multi_reduction <maximumf>, %90, %cst_35 [2] : vector<2x8x8xf32> to vector<2x8xf32>
    %92 = vector.shape_cast %91 : vector<2x8xf32> to vector<2x8x1xf32>
    %93 = vector.broadcast %92 : vector<2x8x1xf32> to vector<2x8x8xf32>
    %94 = arith.subf %90, %93 : vector<2x8x8xf32>
    %95 = math.exp %94 : vector<2x8x8xf32>
    %cst_36 = arith.constant dense<0.000000e+00> : vector<2x8xf32>
    %96 = vector.multi_reduction <add>, %95, %cst_36 [2] : vector<2x8x8xf32> to vector<2x8xf32>
    %97 = vector.shape_cast %96 : vector<2x8xf32> to vector<2x8x1xf32>
    %98 = tpu.reciprocal %97 {approx = true} : vector<2x8x1xf32> -> vector<2x8x1xf32>
    %99 = vector.broadcast %98 : vector<2x8x1xf32> to vector<2x8x8xf32>
    %100 = arith.mulf %95, %99 : vector<2x8x8xf32>
    %101 = arith.addf %71, %100 : vector<2x8x8xf32>
    %102 = arith.truncf %100 : vector<2x8x8xf32> to vector<2x8x8xbf16>
    %103 = arith.truncf %86 : vector<2x8x8xf32> to vector<2x8x8xbf16>
    "tpu.trace_start"() <{level = 10 : i32, message = "bqk,bkd->bqd"}> : () -> ()
    %cst_37 = arith.constant dense<0.000000e+00> : vector<2x8x8xf32>
    %104 = tpu.matmul %102, %103, %cst_37 {dimension_numbers = #tpu.dot_dimension_numbers<[2], [1], [1], [2], [0, 0, 0, 1, 1, 2], [0], [0]>} : vector<2x8x8xbf16>, vector<2x8x8xbf16>, vector<2x8x8xf32> -> vector<2x8x8xf32>
    "tpu.trace_stop"() : () -> ()
    %105 = vector.shape_cast %104 : vector<2x8x8xf32> to vector<16x8xf32>
    %106 = arith.truncf %105 : vector<16x8xf32> to vector<16x8xbf16>
    %c2 = arith.constant 2 : index
    %c0_38 = arith.constant 0 : index
    %c0_39 = arith.constant 0 : index
    %107 = vector.load %arg8[%c2, %c0_38, %c0_39] : memref<4x8x32xbf16, #tpu.memory_space<vmem>>, vector<1x8x32xbf16>
    %108 = vector.shape_cast %107 : vector<1x8x32xbf16> to vector<8x32xbf16>
    %cst_40 = arith.constant dense<0.000000e+00> : vector<16x32xf32>
    %109 = tpu.matmul %106, %108, %cst_40 {dimension_numbers = #tpu.dot_dimension_numbers<[1], [0], [0], [1], [0, 0, 1, 1], [], []>} : vector<16x8xbf16>, vector<8x32xbf16>, vector<16x32xf32> -> vector<16x32xf32>
    %110 = arith.addf %80, %109 : vector<16x32xf32>
    %111 = vector.extract_strided_slice %10 {offsets = [0, 24], sizes = [16, 8], strides = [1, 1]} : vector<16x32xf32> to vector<16x8xf32>
    %112 = vector.shape_cast %111 : vector<16x8xf32> to vector<2x8x8xf32>
    %113 = vector.extract_strided_slice %15 {offsets = [0, 24], sizes = [16, 8], strides = [1, 1]} : vector<16x64xf32> to vector<16x8xf32>
    %114 = vector.shape_cast %113 : vector<16x8xf32> to vector<2x8x8xf32>
    %115 = vector.extract_strided_slice %15 {offsets = [0, 56], sizes = [16, 8], strides = [1, 1]} : vector<16x64xf32> to vector<16x8xf32>
    %116 = vector.shape_cast %115 : vector<16x8xf32> to vector<2x8x8xf32>
    %117 = arith.truncf %112 : vector<2x8x8xf32> to vector<2x8x8xbf16>
    %118 = arith.truncf %114 : vector<2x8x8xf32> to vector<2x8x8xbf16>
    "tpu.trace_start"() <{level = 10 : i32, message = "bqd,bkd->bqk"}> : () -> ()
    %cst_41 = arith.constant dense<0.000000e+00> : vector<2x8x8xf32>
    %119 = tpu.matmul %117, %118, %cst_41 {dimension_numbers = #tpu.dot_dimension_numbers<[2], [2], [1], [1], [0, 0, 0, 1, 1, 1], [0], [0]>} : vector<2x8x8xbf16>, vector<2x8x8xbf16>, vector<2x8x8xf32> -> vector<2x8x8xf32>
    "tpu.trace_stop"() : () -> ()
    %120 = arith.addf %119, %22 : vector<2x8x8xf32>
    %cst_42 = arith.constant dense<0xFF800000> : vector<2x8xf32>
    %121 = vector.multi_reduction <maximumf>, %120, %cst_42 [2] : vector<2x8x8xf32> to vector<2x8xf32>
    %122 = vector.shape_cast %121 : vector<2x8xf32> to vector<2x8x1xf32>
    %123 = vector.broadcast %122 : vector<2x8x1xf32> to vector<2x8x8xf32>
    %124 = arith.subf %120, %123 : vector<2x8x8xf32>
    %125 = math.exp %124 : vector<2x8x8xf32>
    %cst_43 = arith.constant dense<0.000000e+00> : vector<2x8xf32>
    %126 = vector.multi_reduction <add>, %125, %cst_43 [2] : vector<2x8x8xf32> to vector<2x8xf32>
    %127 = vector.shape_cast %126 : vector<2x8xf32> to vector<2x8x1xf32>
    %128 = tpu.reciprocal %127 {approx = true} : vector<2x8x1xf32> -> vector<2x8x1xf32>
    %129 = vector.broadcast %128 : vector<2x8x1xf32> to vector<2x8x8xf32>
    %130 = arith.mulf %125, %129 : vector<2x8x8xf32>
    %131 = arith.addf %101, %130 : vector<2x8x8xf32>
    %132 = arith.truncf %130 : vector<2x8x8xf32> to vector<2x8x8xbf16>
    %133 = arith.truncf %116 : vector<2x8x8xf32> to vector<2x8x8xbf16>
    "tpu.trace_start"() <{level = 10 : i32, message = "bqk,bkd->bqd"}> : () -> ()
    %cst_44 = arith.constant dense<0.000000e+00> : vector<2x8x8xf32>
    %134 = tpu.matmul %132, %133, %cst_44 {dimension_numbers = #tpu.dot_dimension_numbers<[2], [1], [1], [2], [0, 0, 0, 1, 1, 2], [0], [0]>} : vector<2x8x8xbf16>, vector<2x8x8xbf16>, vector<2x8x8xf32> -> vector<2x8x8xf32>
    "tpu.trace_stop"() : () -> ()
    %135 = vector.shape_cast %134 : vector<2x8x8xf32> to vector<16x8xf32>
    %136 = arith.truncf %135 : vector<16x8xf32> to vector<16x8xbf16>
    %c3 = arith.constant 3 : index
    %c0_45 = arith.constant 0 : index
    %c0_46 = arith.constant 0 : index
    %137 = vector.load %arg8[%c3, %c0_45, %c0_46] : memref<4x8x32xbf16, #tpu.memory_space<vmem>>, vector<1x8x32xbf16>
    %138 = vector.shape_cast %137 : vector<1x8x32xbf16> to vector<8x32xbf16>
    %cst_47 = arith.constant dense<0.000000e+00> : vector<16x32xf32>
    %139 = tpu.matmul %136, %138, %cst_47 {dimension_numbers = #tpu.dot_dimension_numbers<[1], [0], [0], [1], [0, 0, 1, 1], [], []>} : vector<16x8xbf16>, vector<8x32xbf16>, vector<16x32xf32> -> vector<16x32xf32>
    %140 = arith.addf %110, %139 : vector<16x32xf32>
    %141 = arith.addf %1, %140 : vector<16x32xf32>
    %c0_48 = arith.constant 0 : index
    %c0_49 = arith.constant 0 : index
    %142 = vector.load %arg9[%c0_48, %c0_49] : memref<1x32xf32, #tpu.memory_space<vmem>>, vector<1x32xf32>
    %143 = vector.broadcast %142 : vector<1x32xf32> to vector<16x32xf32>
    %144 = arith.addf %141, %143 : vector<16x32xf32>
    %cst_50 = arith.constant dense<0.000000e+00> : vector<16xf32>
    %145 = vector.multi_reduction <add>, %144, %cst_50 [1] : vector<16x32xf32> to vector<16xf32>
    %146 = vector.shape_cast %145 : vector<16xf32> to vector<16x1xf32>
    %cst_51 = arith.constant 3.200000e+01 : f32
    %147 = vector.broadcast %cst_51 : f32 to vector<16x1xf32>
    %148 = arith.divf %146, %147 : vector<16x1xf32>
    %149 = vector.broadcast %148 : vector<16x1xf32> to vector<16x32xf32>
    %150 = arith.subf %144, %149 : vector<16x32xf32>
    %151 = arith.mulf %150, %150 : vector<16x32xf32>
    %cst_52 = arith.constant dense<0.000000e+00> : vector<16xf32>
    %152 = vector.multi_reduction <add>, %151, %cst_52 [1] : vector<16x32xf32> to vector<16xf32>
    %153 = vector.shape_cast %152 : vector<16xf32> to vector<16x1xf32>
    %cst_53 = arith.constant 3.200000e+01 : f32
    %154 = vector.broadcast %cst_53 : f32 to vector<16x1xf32>
    %155 = arith.divf %153, %154 : vector<16x1xf32>
    %cst_54 = arith.constant 9.99999974E-6 : f32
    %156 = vector.broadcast %cst_54 : f32 to vector<16x1xf32>
    %157 = arith.addf %155, %156 : vector<16x1xf32>
    %158 = math.rsqrt %157 : vector<16x1xf32>
    %159 = vector.broadcast %158 : vector<16x1xf32> to vector<16x32xf32>
    %160 = arith.mulf %150, %159 : vector<16x32xf32>
    %c0_55 = arith.constant 0 : index
    %c0_56 = arith.constant 0 : index
    %161 = vector.load %arg14[%c0_55, %c0_56] : memref<1x32xf32, #tpu.memory_space<vmem>>, vector<1x32xf32>
    %162 = vector.broadcast %161 : vector<1x32xf32> to vector<16x32xf32>
    %163 = arith.mulf %160, %162 : vector<16x32xf32>
    %c0_57 = arith.constant 0 : index
    %c0_58 = arith.constant 0 : index
    %164 = vector.load %arg15[%c0_57, %c0_58] : memref<1x32xf32, #tpu.memory_space<vmem>>, vector<1x32xf32>
    %165 = vector.broadcast %164 : vector<1x32xf32> to vector<16x32xf32>
    %166 = arith.addf %163, %165 : vector<16x32xf32>
    %167 = arith.truncf %166 : vector<16x32xf32> to vector<16x32xbf16>
    %c0_59 = arith.constant 0 : index
    %c0_60 = arith.constant 0 : index
    %168 = vector.load %arg10[%c0_59, %c0_60] : memref<32x64xbf16, #tpu.memory_space<vmem>>, vector<32x64xbf16>
    %cst_61 = arith.constant dense<0.000000e+00> : vector<16x64xf32>
    %169 = tpu.matmul %167, %168, %cst_61 {dimension_numbers = #tpu.dot_dimension_numbers<[1], [0], [0], [1], [0, 0, 1, 1], [], []>} : vector<16x32xbf16>, vector<32x64xbf16>, vector<16x64xf32> -> vector<16x64xf32>
    %c0_62 = arith.constant 0 : index
    %c0_63 = arith.constant 0 : index
    %170 = vector.load %arg11[%c0_62, %c0_63] : memref<1x64xf32, #tpu.memory_space<vmem>>, vector<1x64xf32>
    %171 = vector.broadcast %170 : vector<1x64xf32> to vector<16x64xf32>
    %172 = arith.addf %169, %171 : vector<16x64xf32>
    %cst_64 = arith.constant 0.000000e+00 : f32
    %173 = vector.broadcast %cst_64 : f32 to vector<16x64xf32>
    %174 = arith.maximumf %172, %173 : vector<16x64xf32>
    %175 = arith.truncf %174 : vector<16x64xf32> to vector<16x64xbf16>
    %c0_65 = arith.constant 0 : index
    %c0_66 = arith.constant 0 : index
    %176 = vector.load %arg12[%c0_65, %c0_66] : memref<64x32xbf16, #tpu.memory_space<vmem>>, vector<64x32xbf16>
    %cst_67 = arith.constant dense<0.000000e+00> : vector<16x32xf32>
    %177 = tpu.matmul %175, %176, %cst_67 {dimension_numbers = #tpu.dot_dimension_numbers<[1], [0], [0], [1], [0, 0, 1, 1], [], []>} : vector<16x64xbf16>, vector<64x32xbf16>, vector<16x32xf32> -> vector<16x32xf32>
    %c0_68 = arith.constant 0 : index
    %c0_69 = arith.constant 0 : index
    %178 = vector.load %arg13[%c0_68, %c0_69] : memref<1x32xf32, #tpu.memory_space<vmem>>, vector<1x32xf32>
    %179 = vector.broadcast %178 : vector<1x32xf32> to vector<16x32xf32>
    %180 = arith.addf %177, %179 : vector<16x32xf32>
    %181 = arith.addf %166, %180 : vector<16x32xf32>
    %cst_70 = arith.constant dense<0.000000e+00> : vector<16xf32>
    %182 = vector.multi_reduction <add>, %181, %cst_70 [1] : vector<16x32xf32> to vector<16xf32>
    %183 = vector.shape_cast %182 : vector<16xf32> to vector<16x1xf32>
    %cst_71 = arith.constant 3.200000e+01 : f32
    %184 = vector.broadcast %cst_71 : f32 to vector<16x1xf32>
    %185 = arith.divf %183, %184 : vector<16x1xf32>
    %186 = vector.broadcast %185 : vector<16x1xf32> to vector<16x32xf32>
    %187 = arith.subf %181, %186 : vector<16x32xf32>
    %188 = arith.mulf %187, %187 : vector<16x32xf32>
    %cst_72 = arith.constant dense<0.000000e+00> : vector<16xf32>
    %189 = vector.multi_reduction <add>, %188, %cst_72 [1] : vector<16x32xf32> to vector<16xf32>
    %190 = vector.shape_cast %189 : vector<16xf32> to vector<16x1xf32>
    %cst_73 = arith.constant 3.200000e+01 : f32
    %191 = vector.broadcast %cst_73 : f32 to vector<16x1xf32>
    %192 = arith.divf %190, %191 : vector<16x1xf32>
    %cst_74 = arith.constant 9.99999974E-6 : f32
    %193 = vector.broadcast %cst_74 : f32 to vector<16x1xf32>
    %194 = arith.addf %192, %193 : vector<16x1xf32>
    %195 = math.rsqrt %194 : vector<16x1xf32>
    %196 = vector.broadcast %195 : vector<16x1xf32> to vector<16x32xf32>
    %197 = arith.mulf %187, %196 : vector<16x32xf32>
    %c0_75 = arith.constant 0 : index
    %c0_76 = arith.constant 0 : index
    %198 = vector.load %arg16[%c0_75, %c0_76] : memref<1x32xf32, #tpu.memory_space<vmem>>, vector<1x32xf32>
    %199 = vector.broadcast %198 : vector<1x32xf32> to vector<16x32xf32>
    %200 = arith.mulf %197, %199 : vector<16x32xf32>
    %c0_77 = arith.constant 0 : index
    %c0_78 = arith.constant 0 : index
    %201 = vector.load %arg17[%c0_77, %c0_78] : memref<1x32xf32, #tpu.memory_space<vmem>>, vector<1x32xf32>
    %202 = vector.broadcast %201 : vector<1x32xf32> to vector<16x32xf32>
    %203 = arith.addf %200, %202 : vector<16x32xf32>
    %204 = vector.shape_cast %203 : vector<16x32xf32> to vector<2x8x32xf32>
    %c0_79 = arith.constant 0 : index
    %c0_80 = arith.constant 0 : index
    %c0_81 = arith.constant 0 : index
    %205 = vector.load %arg18[%c0_79, %c0_80, %c0_81] : memref<2x8x32xf32, #tpu.memory_space<vmem>>, vector<2x8x32xf32>
    tpu.vector_store %arg18[%c0_79, %c0_80, %c0_81], %204 {strides = array<i32>} : memref<2x8x32xf32, #tpu.memory_space<vmem>>, vector<2x8x32xf32>,
    %cst_82 = arith.constant 2.500000e-01 : f32
    %206 = vector.broadcast %cst_82 : f32 to vector<2x8x8xf32>
    %207 = arith.mulf %131, %206 : vector<2x8x8xf32>
    %c0_83 = arith.constant 0 : index
    %c0_84 = arith.constant 0 : index
    %c0_85 = arith.constant 0 : index
    %208 = vector.load %arg19[%c0_83, %c0_84, %c0_85] : memref<2x8x8xf32, #tpu.memory_space<vmem>>, vector<2x8x8xf32>
    tpu.vector_store %arg19[%c0_83, %c0_84, %c0_85], %207 {strides = array<i32>} : memref<2x8x8xf32, #tpu.memory_space<vmem>>, vector<2x8x8xf32>,
    return
  }
  func.func @transform_0(%arg0: i32) -> (i32, i32, i32) {
    %c0_i32 = arith.constant 0 : i32
    %c0_i32_0 = arith.constant 0 : i32
    %c0_i32_1 = arith.constant 0 : i32
    return %arg0, %c0_i32, %c0_i32_0 : i32, i32, i32
  }
  func.func @transform_1(%arg0: i32) -> (i32, i32, i32) {
    %c0_i32 = arith.constant 0 : i32
    %c0_i32_0 = arith.constant 0 : i32
    %c0_i32_1 = arith.constant 0 : i32
    return %arg0, %c0_i32, %c0_i32_0 : i32, i32, i32
  }
  func.func @transform_2(%arg0: i32) -> (i32, i32, i32) {
    %c0_i32 = arith.constant 0 : i32
    %c0_i32_0 = arith.constant 0 : i32
    %c0_i32_1 = arith.constant 0 : i32
    return %arg0, %c0_i32, %c0_i32_0 : i32, i32, i32
  }
  func.func @transform_3(%arg0: i32) -> (i32, i32) {
    %c0_i32 = arith.constant 0 : i32
    %c0_i32_0 = arith.constant 0 : i32
    %c0_i32_1 = arith.constant 0 : i32
    return %c0_i32, %c0_i32_0 : i32, i32
  }
  func.func @transform_4(%arg0: i32) -> (i32, i32) {
    %c0_i32 = arith.constant 0 : i32
    %c0_i32_0 = arith.constant 0 : i32
    %c0_i32_1 = arith.constant 0 : i32
    return %c0_i32, %c0_i32_0 : i32, i32
  }
  func.func @transform_5(%arg0: i32) -> (i32, i32) {
    %c0_i32 = arith.constant 0 : i32
    %c0_i32_0 = arith.constant 0 : i32
    %c0_i32_1 = arith.constant 0 : i32
    return %c0_i32, %c0_i32_0 : i32, i32
  }
  func.func @transform_6(%arg0: i32) -> (i32, i32) {
    %c0_i32 = arith.constant 0 : i32
    %c0_i32_0 = arith.constant 0 : i32
    %c0_i32_1 = arith.constant 0 : i32
    return %c0_i32, %c0_i32_0 : i32, i32
  }
  func.func @transform_7(%arg0: i32) -> (i32, i32, i32) {
    %c0_i32 = arith.constant 0 : i32
    %c0_i32_0 = arith.constant 0 : i32
    %c0_i32_1 = arith.constant 0 : i32
    %c0_i32_2 = arith.constant 0 : i32
    return %c0_i32, %c0_i32_0, %c0_i32_1 : i32, i32, i32
  }
  func.func @transform_8(%arg0: i32) -> (i32, i32) {
    %c0_i32 = arith.constant 0 : i32
    %c0_i32_0 = arith.constant 0 : i32
    %c0_i32_1 = arith.constant 0 : i32
    return %c0_i32, %c0_i32_0 : i32, i32
  }
  func.func @transform_9(%arg0: i32) -> (i32, i32) {
    %c0_i32 = arith.constant 0 : i32
    %c0_i32_0 = arith.constant 0 : i32
    %c0_i32_1 = arith.constant 0 : i32
    return %c0_i32, %c0_i32_0 : i32, i32
  }
  func.func @transform_10(%arg0: i32) -> (i32, i32) {
    %c0_i32 = arith.constant 0 : i32
    %c0_i32_0 = arith.constant 0 : i32
    %c0_i32_1 = arith.constant 0 : i32
    return %c0_i32, %c0_i32_0 : i32, i32
  }
  func.func @transform_11(%arg0: i32) -> (i32, i32) {
    %c0_i32 = arith.constant 0 : i32
    %c0_i32_0 = arith.constant 0 : i32
    %c0_i32_1 = arith.constant 0 : i32
    return %c0_i32, %c0_i32_0 : i32, i32
  }
  func.func @transform_12(%arg0: i32) -> (i32, i32) {
    %c0_i32 = arith.constant 0 : i32
    %c0_i32_0 = arith.constant 0 : i32
    %c0_i32_1 = arith.constant 0 : i32
    return %c0_i32, %c0_i32_0 : i32, i32
  }
  func.func @transform_13(%arg0: i32) -> (i32, i32) {
    %c0_i32 = arith.constant 0 : i32
    %c0_i32_0 = arith.constant 0 : i32
    %c0_i32_1 = arith.constant 0 : i32
    return %c0_i32, %c0_i32_0 : i32, i32
  }
  func.func @transform_14(%arg0: i32) -> (i32, i32) {
    %c0_i32 = arith.constant 0 : i32
    %c0_i32_0 = arith.constant 0 : i32
    %c0_i32_1 = arith.constant 0 : i32
    return %c0_i32, %c0_i32_0 : i32, i32
  }
  func.func @transform_15(%arg0: i32) -> (i32, i32) {
    %c0_i32 = arith.constant 0 : i32
    %c0_i32_0 = arith.constant 0 : i32
    %c0_i32_1 = arith.constant 0 : i32
    return %c0_i32, %c0_i32_0 : i32, i32
  }
  func.func @transform_16(%arg0: i32) -> (i32, i32) {
    %c0_i32 = arith.constant 0 : i32
    %c0_i32_0 = arith.constant 0 : i32
    %c0_i32_1 = arith.constant 0 : i32
    return %c0_i32, %c0_i32_0 : i32, i32
  }
  func.func @transform_17(%arg0: i32) -> (i32, i32, i32) {
    %c0_i32 = arith.constant 0 : i32
    %c0_i32_0 = arith.constant 0 : i32
    %c0_i32_1 = arith.constant 0 : i32
    return %arg0, %c0_i32, %c0_i32_0 : i32, i32, i32
  }
  func.func @transform_18(%arg0: i32) -> (i32, i32, i32) {
    %c0_i32 = arith.constant 0 : i32
    %c0_i32_0 = arith.constant 0 : i32
    %c0_i32_1 = arith.constant 0 : i32
    return %arg0, %c0_i32, %c0_i32_0 : i32, i32, i32
  }
}

</mosaic_0001>

<bundles_post_ra>
// kernel: tpu_custom_call.1
= control target key start
LH: loop header
LB: loop body
LE: loop exit
PB: predicated region body
PF: predicated region fallthrough
CT: control target
= control target key end

     0   :  { %s1710_s0 = inlined_call_operand.vmem [shape: f32[2,8,32], index: 0, kind: input, shape index: {}]   ;;  %s1711_s1 = inlined_call_operand.vmem [shape: f32[2,8,32], index: 1, kind: input, shape index: {}]   ;;  %s1712_s2 = inlined_call_operand.hbm [shape: f32[2,1,8], index: 2, kind: input, shape index: {}]   ;;  %s1713_s3 = inlined_call_operand.vmem [shape: bf16[32,32], index: 3, kind: input, shape index: {}]   ;;  %s1714_s4 = inlined_call_operand.vmem [shape: f32[1,32], index: 4, kind: input, shape index: {}]   ;;  %s1715_s5 = inlined_call_operand.hbm [shape: bf16[32,64], index: 5, kind: input, shape index: {}]   ;;  %s1716_s6 = inlined_call_operand.vmem [shape: f32[1,64], index: 6, kind: input, shape index: {}]   ;;  %s1717_s7 = inlined_call_operand.hbm [shape: bf16[4,8,32], index: 7, kind: input, shape index: {}]   ;;  %s1718_s8 = inlined_call_operand.vmem [shape: f32[1,32], index: 8, kind: input, shape index: {}]   ;;  %s1719_s9 = inlined_call_operand.hbm [shape: bf16[32,64], index: 9, kind: input, shape index: {}]   ;;  %s1720_s10 = inlined_call_operand.vmem [shape: f32[1,64], index: 10, kind: input, shape index: {}]   ;;  %s1721_s11 = inlined_call_operand.vmem [shape: bf16[64,32], index: 11, kind: input, shape index: {}]   ;;  %s1722_s12 = inlined_call_operand.vmem [shape: f32[1,32], index: 12, kind: input, shape index: {}]   ;;  %s1723_s13 = inlined_call_operand.vmem [shape: f32[1,32], index: 13, kind: input, shape index: {}]   ;;  %s1724_s14 = inlined_call_operand.vmem [shape: f32[1,32], index: 14, kind: input, shape index: {}]   ;;  %s1725_s15 = inlined_call_operand.vmem [shape: f32[1,32], index: 15, kind: input, shape index: {}]   ;;  %s1726_s16 = inlined_call_operand.vmem [shape: f32[1,32], index: 16, kind: input, shape index: {}]   ;;  %s1727_s17 = inlined_call_operand.hbm [shape: f32[2,8,32], index: 17, kind: output, shape index: {0}]   ;;  %s1728_s18 = inlined_call_operand.hbm [shape: f32[2,8,8], index: 18, kind: output, shape index: {1}]  }
   0x1   :  { %1731 = sst [smem:[#allocation18_spill]] %s1710_s0 }
   0x2   :  { %1732 = sst [smem:[#allocation19_spill]] %s1711_s1 }
   0x3   :  { %1733 = sst [smem:[#allocation20_spill]] %s1712_s2 }
   0x4   :  { %1734 = sst [smem:[#allocation21_spill]] %s1727_s17 }
   0x5   :  { %24 = vsyncpa [#allocation3], 0 }
   0x6   :  { %25 = vsyncpa [#allocation6], 0 }
   0x7   :  { %26 = vsyncpa [#allocation9], 0 }
   0x8   :  { %27 = vsyncpa [#allocation4], 0  ;;  %s54_s29 = sshll.u32 %s1715_s5, 4  ;;  %s55_s29 = int_to_ptr.hbm [resolvable:$true] %s54_s29 }
   0x9   :  { %28 = vsyncpa [#allocation12], 0  ;;  %s1346_s30 = smov [#allocation5]   ;;  %s1735_s20 = sld [smem:[#allocation20_spill]] }
   0xa   :  { %s56_s0 = sshll.u32 %s1346_s30, 4  ;;  %s1347_s22 = smov 64   ;;  %s57_s0 = int_to_ptr.vmem [resolvable:$true] %s56_s0 }
   0xb   :  { %s1348_s2 = smov 4   ;;  %s1349_s23 = smov [#allocation2]  }
   0xc   :  { %62 = dma.hbm_to_vmem [thread:$0]  %s55_s29, 256, %s57_s0, [#allocation6], %s1347_s22, %s1347_s22, %s1348_s2  }
   0xd   :  { %s39_s24 = sshll.u32 %s1349_s23, 4  ;;  %s1350_s25 = smov 16   ;;  %s40_s24 = int_to_ptr.vmem [resolvable:$true] %s39_s24 }
   0xe   :  { %s1351_s26 = smov 1   ;;  %s69_s28 = sshll.u32 %s1717_s7, 4  ;;  %s70_s28 = int_to_ptr.hbm [resolvable:$true] %s69_s28 }
   0xf   :  { %s37_s21 = sshll.u32 %s1735_s20, 4  ;;  %s1352_s30 = smov [#allocation7]   ;;  %s38_s21 = int_to_ptr.hbm [resolvable:$true] %s37_s21 }
  0x10   :  { %45 = dma.hbm_to_vmem [thread:$0]  %s38_s21, 32, %s40_s24, [#allocation3], %s1350_s25, %s1350_s25, %s1351_s26  }
  0x11   :  { %s71_s17 = sshll.u32 %s1352_s30, 4  ;;  %s84_s20 = sshll.u32 %s1719_s9, 4  ;;  %s72_s17 = int_to_ptr.vmem [resolvable:$true] %s71_s17  ;;  %s85_s20 = int_to_ptr.hbm [resolvable:$true] %s84_s20 }
  0x12   :  { %77 = dma.hbm_to_vmem [thread:$0]  %s70_s28, 256, %s72_s17, [#allocation6], %s1347_s22, %s1347_s22, %s1348_s2  }
  0x13   :  { %s1353_s29 = smov [#allocation8]  }
  0x14   :  { %s86_s0 = sshll.u32 %s1353_s29, 4  ;;  %s87_s0 = int_to_ptr.vmem [resolvable:$true] %s86_s0 }
  0x15   :  { %92 = dma.hbm_to_vmem [thread:$0]  %s85_s20, 256, %s87_s0, [#allocation9], %s1347_s22, %s1347_s22, %s1348_s2  }
  0x16   :  { %1336 = dma.done.wait [#allocation3], 32  }
  0x17   :  { %1337 = vsyncadd [#allocation3], 4294967264 }
  0x18   :  { %1338 = dma.done.wait [#allocation6], 512  }
  0x19   :  { %1339 = vsyncadd [#allocation6], 4294966784 }
  0x1a   :  { %1340 = dma.done.wait [#allocation9], 256  }
  0x1b   :  { %1341 = vsyncadd [#allocation9], 4294967040  ;;  %v1112_v0 = vld [vmem:[%s1713_s3 + $0x8] sm:$0xff]  ;;  %v1111_v2 = vld [vmem:[%s1713_s3] sm:$0xff]  ;;  %s1736_s25 = sld [smem:[#allocation18_spill]]  ;;  %vm150_vm0 = vcmask 261120  }
  0x1c   :  { %v1114_v1 = vld [vmem:[#allocation5 + $0x8] sm:$0xff]  ;;  %v1113_v3 = vld [vmem:[#allocation5] sm:$0xff]  ;;  %160 = vmatpush.bf16.msra.mxu0 %v1112_v0  ;;  %s1737_s27 = sld [smem:[#allocation19_spill]]  ;;  %v1141_v10 = vld [vmem:[%s1714_s4] ss:$0 sm:$0xff]  ;;  %vm221_vm1 = vcmask 64512  }
  0x1d   :  { %197 = vmatpush.bf16.msra.mxu1 %v1114_v1  ;;  %v1142_v11 = vld [vmem:[%s1716_s6] ss:$0 sm:$0xff]  ;;  %s1354_s4 = smov 120   ;;  %s1355_s6 = smov 96   ;;  %v206_v42 = vld [vmem:[#allocation2 + $0x1] sm:$0x1] }
  0x1e   :  { %s1356_s29 = smov 88   ;;  %s1357_s0 = smov 112   ;;  %v205_v36 = vld [vmem:[#allocation2] sm:$0x1]  ;;  %v1064_v45 = vadd.f32 -1.0, %v206_v42  ;;  %vm292_vm2 = vcmask 1043456  }
  0x1f   :  { %v1063_v40 = vadd.f32 -1.0, %v205_v36  ;;  %s1358_s7 = smov 80   ;;  %s1359_s21 = smov 104   ;;  %vm924_vm10 = vcmask 523264  }
  0x20   :  { %161 = vmatpush.bf16.msra.mxu0 %v1111_v2  ;;  %v210_v48 = vmul.f32 1e+30, %v1064_v45  ;;  %s1360_s23 = smov 72   ;;  %s1738_s17 = sld [smem:[#allocation21_spill]] }
  0x21   :  { %v1482_v4 = vld [vmem:[%s1736_s25] sm:$0xff]  ;;  %v1487_v5 = vld [vmem:[%s1736_s25 + $0x8] sm:$0xff]  ;;  %198 = vmatpush.bf16.msra.mxu1 %v1113_v3  ;;  %v209_v41 = vmul.f32 1e+30, %v1063_v40 }
  0x22   :  { %v127_v6 = vld [vmem:[%s1737_s27] sm:$0xff]  ;;  %v128_v7 = vld [vmem:[%s1737_s27 + $0x8] sm:$0xff]  ;;  %v126_v8 = vpack.c.bf16 %v1487_v5, %v1482_v4  ;;  %v1536_v52 = vperm.slane %v210_v48, 0 }
  0x23   :  { %v129_v9 = vpack.c.bf16 %v128_v7, %v127_v6  ;;  %v1531_v44 = vperm.slane %v209_v41, 0 }
  0x24   :  { %1053 = vmatmul.msk.bf16.vlgmr.msra.gmra.mxu0 %vm150_vm0, %v126_v8 }
  0x25   :  { %1062 = vmatmul.msk.bf16.vlgmr.msra.gmra.mxu1 %vm150_vm0, %v129_v9 }
  0x26   :  { %s1012_s25 = sshll.u32 %s1738_s17, 4  ;;  %s1013_s25 = int_to_ptr.hbm [resolvable:$true] %s1012_s25 }
  0xa1   :  { %v163_v12 = vpop.f32.mrf.mxu0 }
  0xa2   :  { %v200_v13 = vpop.f32.mrf.mxu1  ;;  %v164_v14 = vadd.f32 %v1141_v10, %v163_v12 }
  0xa3   :  { %v201_v15 = vadd.f32 %v1142_v11, %v200_v13 }
  0xa4   :  { %v217_v17 = vpack.c.bf16 %v164_v14, %v164_v14 }
  0xa5   :  { %v219_v16 = vpack.c.bf16 %v201_v15, %v201_v15 }
  0xa6   :  { %v336_v23 = vunpack.c.l.b16 %v217_v17 }
  0xa7   :  { %v285_v18 = vunpack.c.l.b16 %v219_v16  ;;  %v226_v19 = vsel %vm221_vm1, %v219_v16, 0 }
  0xa8   :  { %235 = vmatpush.bf16.xpose.msra.mxu2 %v226_v19  ;;  %v1509_v27 = vpack.c.b16 %v336_v23, %v336_v23 }
  0xa9   :  { %v1506_v20 = vpack.c.b16 %v285_v18, %v285_v18  ;;  %v165_v21 = vpop.f32.mrf.mxu0 }
  0xaa   :  { %v202_v22 = vpop.f32.mrf.mxu1  ;;  %v166_v25 = vadd.f32 %v1141_v10, %v165_v21 }
  0xab   :  { %v203_v24 = vadd.f32 %v1142_v11, %v202_v22  ;;  %340 = vrot.lane.b32.xlu0 %v1506_v20, %s1354_s4 }
  0xac   :  { %v218_v30 = vpack.c.bf16 %v166_v25, %v166_v25 }
  0xad   :  { %v220_v26 = vpack.c.bf16 %v203_v24, %v203_v24 }
  0xae   :  { %v362_v32 = vunpack.c.l.b16 %v218_v30 }
  0xaf   :  { %v310_v28 = vunpack.c.l.b16 %v220_v26  ;;  %1065 = vmatmul.msk.bf16.vlgmr.msra.gmra.mxu2 %vm221_vm1, %v217_v17  ;;  %v245_v29 = vsel %vm221_vm1, %v220_v26, 0 }
  0xb0   :  { %254 = vmatpush.bf16.xpose.msra.mxu3 %v245_v29  ;;  %v1518_v33 = vpack.c.b16 %v362_v32, %v362_v32 }
  0xb1   :  { %v1513_v31 = vpack.c.b16 %v310_v28, %v310_v28 }
  0xb3   :  { %366 = vrot.lane.b32.xlu1 %v1513_v31, %s1354_s4  ;;  %338 = vrot.lane.b32.xlu0 %v1509_v27, %s1354_s4 }
  0xb7   :  { %1066 = vmatmul.msk.bf16.vlgmr.msra.gmra.mxu3 %vm221_vm1, %v218_v30 }
  0xbb   :  { %364 = vrot.lane.b32.xlu1 %v1518_v33, %s1354_s4 }
  0xc3   :  { %287 = vrot.lane.b32.xlu1 %v1506_v20, %s1355_s6 }
  0xcb   :  { %413 = vrot.lane.b32.xlu1 %v1506_v20, %s1356_s29 }
  0xd3   :  { %498 = vrot.lane.b32.xlu1 %v1509_v27, %s1357_s0 }
 0x11d   :  { %v341_v34 = vpop.permute.xlu0 %340 }
 0x11e   :  { %v346_v35 = vsel %vm221_vm1, %v341_v34, 0 }
 0x11f   :  { %355 = vmatpush.bf16.xpose.msrb.mxu2 %v346_v35 }
 0x125   :  { %v367_v37 = vpop.permute.xlu1 %366  ;;  %v339_v38 = vpop.permute.xlu0 %338 }
 0x126   :  { %1069 = vmatmul.msk.bf16.vlgmr.msrb.gmra.mxu2 %vm221_vm1, %v339_v38  ;;  %v372_v39 = vsel %vm221_vm1, %v367_v37, 0 }
 0x127   :  { %381 = vmatpush.bf16.xpose.msrb.mxu3 %v372_v39  ;;  %v334_v39 = vld [vmem:[#allocation7] sm:$0xf] }
 0x128   :  { %v482_v40 = vsel %vm292_vm2, %v334_v39, 0 }
 0x12d   :  { %v365_v43 = vpop.permute.xlu1 %364 }
 0x12e   :  { %1070 = vmatmul.msk.bf16.vlgmr.msrb.gmra.mxu3 %vm221_vm1, %v365_v43 }
 0x12f   :  { %491 = vmatpush.bf16.msra.mxu3 %v482_v40 }
 0x132   :  { %v237_v46 = vpop.f32.mrf.mxu2 }
 0x133   :  { %v238_v47 = vadd.f32 %v237_v46, %v1531_v44 }
 0x135   :  { %v288_v49 = vpop.permute.xlu1 %287  ;;  %v260_v50 = vsel %vm221_vm1, %v238_v47, -inf }
 0x136   :  { %261 = vmax.xlane.f32.xlu2 %v260_v50  ;;  %v294_v51 = vsel %vm292_vm2, %v288_v49, 0 }
 0x137   :  { %303 = vmatpush.bf16.msrb.mxu0 %v294_v51 }
 0x13a   :  { %v239_v53 = vpop.f32.mrf.mxu2  ;;  %v256_v54 = vpop.f32.mrf.mxu3 }
 0x13b   :  { %v257_v55 = vadd.f32 %v256_v54, %v1536_v52 }
 0x13d   :  { %v414_v56 = vpop.permute.xlu1 %413  ;;  %v263_v57 = vsel %vm221_vm1, %v257_v55, -inf }
 0x13e   :  { %v419_v58 = vsel %vm292_vm2, %v414_v56, 0  ;;  %264 = vmax.xlane.f32.xlu1 %v263_v57 }
 0x13f   :  { %428 = vmatpush.bf16.msra.mxu0 %v419_v58 }
 0x142   :  { %v258_v59 = vpop.f32.mrf.mxu3 }
 0x145   :  { %v1541_v60 = vpop.permute.xlu1 %498 }
 0x1a9   :  { %v357_v61 = vpop.f32.mrf.mxu2  ;;  %v262_v62 = vpop.xlane.xlu2 %261 }
 0x1aa   :  { %v358_v63 = vadd.f32 %v357_v61, %v1531_v44  ;;  %v266_v0 = vsub.f32 %v238_v47, %v262_v62 }
 0x1ac   :  { %v268_v1 = vmul.f32 1.442695, %v266_v0  ;;  %v387_v2 = vsel %vm221_vm1, %v358_v63, -inf }
 0x1ad   :  { %388 = vmax.xlane.f32.xlu2 %v387_v2 }
 0x1ae   :  { %1150 = vpow2.f32 %v268_v1 }
 0x1b1   :  { %v383_v3 = vpop.f32.mrf.mxu3  ;;  %v265_v6 = vpop.xlane.xlu1 %264 }
 0x1b2   :  { %v267_v7 = vsub.f32 %v257_v55, %v265_v6  ;;  %v359_v8 = vpop.f32.mrf.mxu2  ;;  %v384_v36 = vadd.f32 %v383_v3, %v1536_v52  ;;  %v457_v3 = vld [vmem:[#allocation7 + $0x4] sm:$0xf] }
 0x1b3   :  { %v462_v6 = vsel %vm292_vm2, %v457_v3, 0 }
 0x1b4   :  { %v1151_v9 = vpop.eup %1150  ;;  %v270_v10 = vmul.f32 1.442695, %v267_v7  ;;  %v390_v37 = vsel %vm221_vm1, %v384_v36, -inf  ;;  %471 = vmatpush.bf16.msra.mxu2 %v462_v6 }
 0x1b5   :  { %v272_v11 = vsel %vm221_vm1, %v1151_v9, 0.0 }
 0x1b6   :  { %1152 = vpow2.f32 %v270_v10  ;;  %273 = vadd.xlane.f32.xlu0 %v272_v11 }
 0x1b9   :  { %v385_v12 = vpop.f32.mrf.mxu3 }
 0x1bc   :  { %v1153_v13 = vpop.eup %1152 }
 0x1bd   :  { %v275_v14 = vsel %vm221_vm1, %v1153_v13, 0.0 }
 0x1be   :  { %276 = vadd.xlane.f32.xlu0 %v275_v14 }
 0x1d2   :  { %312 = vrot.lane.b32.xlu0 %v1513_v31, %s1355_s6  ;;  %s1025_s6 = sshll.u32 %s1728_s18, 4  ;;  %s1026_s6 = int_to_ptr.hbm [resolvable:$true] %s1025_s6 }
 0x1da   :  { %434 = vrot.lane.b32.xlu0 %v1513_v31, %s1356_s29  ;;  %s1363_s29 = smov 128  }
 0x220   :  { %v389_v15 = vpop.xlane.xlu2 %388 }
 0x221   :  { %v393_v16 = vsub.f32 %v358_v63, %v389_v15 }
 0x223   :  { %v395_v17 = vmul.f32 1.442695, %v393_v16 }
 0x225   :  { %1154 = vpow2.f32 %v395_v17 }
 0x229   :  { %v274_v18 = vpop.xlane.xlu0 %273 }
 0x22a   :  { %1156 = vrcp.f32 %v274_v18 }
 0x22b   :  { %v1155_v19 = vpop.eup %1154 }
 0x22c   :  { %v399_v21 = vsel %vm221_vm1, %v1155_v19, 0.0 }
 0x22d   :  { %400 = vadd.xlane.f32.xlu2 %v399_v21 }
 0x230   :  { %v1157_v22 = vpop.eup %1156 }
 0x231   :  { %v1552_v23 = vmul.f32 %v1157_v22, %v1151_v9  ;;  %v277_v25 = vpop.xlane.xlu0 %276 }
 0x232   :  { %1158 = vrcp.f32 %v277_v25 }
 0x233   :  { %v282_v24 = vpack.c.bf16 %v1552_v23, %v1552_v23 }
 0x235   :  { %1067 = vmatmul.msk.bf16.vlgmr.msrb.gmra.mxu0 %vm221_vm1, %v282_v24 }
 0x238   :  { %v1159_v26 = vpop.eup %1158 }
 0x239   :  { %v1557_v28 = vmul.f32 %v1159_v26, %v1153_v13 }
 0x23b   :  { %v283_v32 = vpack.c.bf16 %v1557_v28, %v1557_v28 }
 0x244   :  { %v313_v29 = vpop.permute.xlu0 %312 }
 0x245   :  { %500 = vrot.lane.b32.xlu2 %v1506_v20, %s1357_s0  ;;  %v318_v30 = vsel %vm292_vm2, %v313_v29, 0 }
 0x246   :  { %327 = vmatpush.bf16.msrb.mxu1 %v318_v30 }
 0x249   :  { %1068 = vmatmul.msk.bf16.vlgmr.msrb.gmra.mxu1 %vm221_vm1, %v283_v32 }
 0x24c   :  { %v435_v34 = vpop.permute.xlu0 %434 }
 0x24d   :  { %v440_v35 = vsel %vm292_vm2, %v435_v34, 0 }
 0x24e   :  { %449 = vmatpush.bf16.msra.mxu1 %v440_v35 }
 0x26e   :  { %391 = vmax.xlane.f32.xlu2 %v390_v37 }
 0x286   :  { %523 = vrot.lane.b32.xlu2 %v1513_v31, %s1357_s0 }
 0x2a0   :  { %v401_v38 = vpop.xlane.xlu2 %400 }
 0x2a1   :  { %1160 = vrcp.f32 %v401_v38 }
 0x2a7   :  { %v1161_v41 = vpop.eup %1160 }
 0x2a8   :  { %v1571_v42 = vmul.f32 %v1161_v41, %v1155_v19  ;;  %v501_v43 = vpop.permute.xlu2 %500 }
 0x2a9   :  { %v506_v45 = vsel %vm221_vm1, %v501_v43, 0 }
 0x2aa   :  { %v411_v46 = vpack.c.bf16 %v1571_v42, %v1571_v42  ;;  %515 = vmatpush.bf16.xpose.msrb.mxu0 %v506_v45  ;;  %v409_v38 = vadd.f32 %v1571_v42, %v1552_v23 }
 0x2ac   :  { %1071 = vmatmul.msk.bf16.vlgmr.msra.gmra.mxu0 %vm221_vm1, %v411_v46 }
 0x2b2   :  { %v305_v47 = vpop.f32.mrf.mxu0 }
 0x2ba   :  { %v307_v48 = vpop.f32.mrf.mxu0 }
 0x2bc   :  { %1075 = vmatmul.msk.bf16.vlgmr.msrb.gmra.mxu0 %vm221_vm1, %v1541_v60 }
 0x2c6   :  { %v329_v49 = vpop.f32.mrf.mxu1 }
 0x2c7   :  { %v333_v50 = vpack.c.bf16 %v329_v49, %v305_v47  ;;  %v614_v47 = vld [vmem:[#allocation7 + $0x8] sm:$0xf] }
 0x2c9   :  { %1074 = vmatmul.msk.bf16.vlgmr.msra.gmra.mxu3 %vm221_vm1, %v333_v50 }
 0x2ce   :  { %v331_v51 = vpop.f32.mrf.mxu1 }
 0x2e1   :  { %v392_v53 = vpop.xlane.xlu2 %391 }
 0x2e2   :  { %v394_v54 = vsub.f32 %v384_v36, %v392_v53 }
 0x2e4   :  { %v397_v55 = vmul.f32 1.442695, %v394_v54 }
 0x2e6   :  { %1162 = vpow2.f32 %v397_v55 }
 0x2e9   :  { %v524_v56 = vpop.permute.xlu2 %523 }
 0x2ea   :  { %v529_v57 = vsel %vm221_vm1, %v524_v56, 0 }
 0x2eb   :  { %538 = vmatpush.bf16.xpose.msrb.mxu1 %v529_v57 }
 0x2ec   :  { %v1163_v58 = vpop.eup %1162 }
 0x2ed   :  { %v402_v59 = vsel %vm221_vm1, %v1163_v58, 0.0 }
 0x2ee   :  { %403 = vadd.xlane.f32.xlu1 %v402_v59 }
 0x307   :  { %521 = vrot.lane.b32.xlu1 %v1518_v33, %s1357_s0  ;;  %s1364_s0 = smov 8  }
 0x30f   :  { %570 = vrot.lane.b32.xlu1 %v1506_v20, %s1358_s7 }
 0x317   :  { %639 = vrot.lane.b32.xlu1 %v1506_v20, %s1359_s21 }
 0x31f   :  { %662 = vrot.lane.b32.xlu1 %v1513_v31, %s1359_s21 }
 0x327   :  { %660 = vrot.lane.b32.xlu1 %v1518_v33, %s1359_s21 }
 0x329   :  { %v430_v60 = vpop.f32.mrf.mxu0 }
 0x331   :  { %v432_v61 = vpop.f32.mrf.mxu0 }
 0x339   :  { %v517_v62 = vpop.f32.mrf.mxu0 }
 0x33a   :  { %v518_v63 = vadd.f32 %v517_v62, %v1531_v44 }
 0x33c   :  { %v544_v0 = vsel %vm221_vm1, %v518_v63, -inf }
 0x33d   :  { %545 = vmax.xlane.f32.xlu0 %v544_v0 }
 0x341   :  { %v519_v1 = vpop.f32.mrf.mxu0 }
 0x351   :  { %637 = vrot.lane.b32.xlu0 %v1509_v27, %s1359_s21 }
 0x359   :  { %591 = vrot.lane.b32.xlu0 %v1513_v31, %s1358_s7 }
 0x361   :  { %v404_v2 = vpop.xlane.xlu1 %403 }
 0x362   :  { %1164 = vrcp.f32 %v404_v2 }
 0x368   :  { %v1165_v33 = vpop.eup %1164 }
 0x369   :  { %v1593_v7 = vmul.f32 %v1165_v33, %v1163_v58 }
 0x36b   :  { %v412_v8 = vpack.c.bf16 %v1593_v7, %v1593_v7  ;;  %v410_v1 = vadd.f32 %v1593_v7, %v1557_v28  ;;  %v493_v7 = vpop.f32.mrf.mxu3 }
 0x36d   :  { %1072 = vmatmul.msk.bf16.vlgmr.msra.gmra.mxu1 %vm221_vm1, %v412_v8 }
 0x379   :  { %v522_v9 = vpop.permute.xlu1 %521 }
 0x37d   :  { %1076 = vmatmul.msk.bf16.vlgmr.msrb.gmra.mxu1 %vm221_vm1, %v522_v9 }
 0x381   :  { %v571_v27 = vpop.permute.xlu1 %570 }
 0x382   :  { %v576_v10 = vsel %vm292_vm2, %v571_v27, 0 }
 0x383   :  { %585 = vmatpush.bf16.msrb.mxu2 %v576_v10 }
 0x389   :  { %v640_v11 = vpop.permute.xlu1 %639 }
 0x38a   :  { %v645_v12 = vsel %vm221_vm1, %v640_v11, 0 }
 0x38b   :  { %654 = vmatpush.bf16.xpose.msra.mxu1 %v645_v12 }
 0x391   :  { %v663_v22 = vpop.permute.xlu1 %662 }
 0x392   :  { %v668_v26 = vsel %vm221_vm1, %v663_v22, 0 }
 0x399   :  { %v661_v46 = vpop.permute.xlu1 %660 }
 0x3b0   :  { %v546_v13 = vpop.xlane.xlu0 %545 }
 0x3b1   :  { %v550_v14 = vsub.f32 %v518_v63, %v546_v13 }
 0x3b3   :  { %v552_v15 = vmul.f32 1.442695, %v550_v14  ;;  %v495_v14 = vpop.f32.mrf.mxu3 }
 0x3b5   :  { %1166 = vpow2.f32 %v552_v15 }
 0x3bb   :  { %v1167_v16 = vpop.eup %1166 }
 0x3bc   :  { %v556_v17 = vsel %vm221_vm1, %v1167_v16, 0.0 }
 0x3bd   :  { %557 = vadd.xlane.f32.xlu2 %v556_v17 }
 0x3c3   :  { %v638_v18 = vpop.permute.xlu0 %637 }
 0x3c4   :  { %1080 = vmatmul.msk.bf16.vlgmr.msra.gmra.mxu1 %vm221_vm1, %v638_v18 }
 0x3cb   :  { %v592_v19 = vpop.permute.xlu0 %591 }
 0x3cc   :  { %v597_v21 = vsel %vm292_vm2, %v592_v19, 0 }
 0x3cd   :  { %606 = vmatpush.bf16.msrb.mxu3 %v597_v21 }
 0x3ea   :  { %v451_v24 = vpop.f32.mrf.mxu1 }
 0x3eb   :  { %v455_v25 = vpack.c.bf16 %v451_v24, %v430_v60 }
 0x3ed   :  { %1073 = vmatmul.msk.bf16.vlgmr.msra.gmra.mxu2 %vm221_vm1, %v455_v25 }
 0x3ee   :  { %677 = vmatpush.bf16.xpose.msra.mxu2 %v668_v26 }
 0x3f2   :  { %v453_v29 = vpop.f32.mrf.mxu1 }
 0x3fa   :  { %v540_v30 = vpop.f32.mrf.mxu1 }
 0x3fb   :  { %v541_v32 = vadd.f32 %v540_v30, %v1536_v52 }
 0x3fd   :  { %v547_v34 = vsel %vm221_vm1, %v541_v32, -inf }
 0x3fe   :  { %548 = vmax.xlane.f32.xlu1 %v547_v34 }
 0x402   :  { %v542_v35 = vpop.f32.mrf.mxu1 }
 0x417   :  { %730 = vrot.lane.b32.xlu1 %v1513_v31, %s1360_s23  ;;  %v619_v31 = vsel %vm292_vm2, %v614_v47, 0 }
 0x418   :  { %628 = vmatpush.bf16.msra.mxu0 %v619_v31 }
 0x430   :  { %v558_v36 = vpop.xlane.xlu2 %557 }
 0x431   :  { %1168 = vrcp.f32 %v558_v36 }
 0x437   :  { %v1169_v37 = vpop.eup %1168 }
 0x438   :  { %v564_v39 = vmul.f32 %v1169_v37, %v1167_v16 }
 0x43a   :  { %v1612_v40 = vadd.f32 %v564_v39, %v409_v38  ;;  %v568_v41 = vpack.c.bf16 %v564_v39, %v564_v39 }
 0x43c   :  { %1077 = vmatmul.msk.bf16.vlgmr.msrb.gmra.mxu2 %vm221_vm1, %v568_v41 }
 0x441   :  { %v656_v43 = vpop.f32.mrf.mxu1 }
 0x442   :  { %v657_v51 = vadd.f32 %v656_v43, %v1531_v44 }
 0x444   :  { %v683_v53 = vsel %vm221_vm1, %v657_v51, -inf }
 0x449   :  { %v658_v45 = vpop.f32.mrf.mxu1 }
 0x44c   :  { %1081 = vmatmul.msk.bf16.vlgmr.msra.gmra.mxu2 %vm221_vm1, %v661_v46 }
 0x470   :  { %v473_v56 = vpop.f32.mrf.mxu2 }
 0x471   :  { %v549_v48 = vpop.xlane.xlu1 %548  ;;  %v494_v37 = vadd.f32 %v493_v7, %v473_v56  ;;  %v1115_v7 = vld [vmem:[#allocation8] sm:$0xff] }
 0x472   :  { %v551_v49 = vsub.f32 %v541_v32, %v549_v48 }
 0x474   :  { %v554_v50 = vmul.f32 1.442695, %v551_v49 }
 0x476   :  { %1170 = vpow2.f32 %v554_v50 }
 0x478   :  { %v1621_v57 = vpop.f32.mrf.mxu2 }
 0x47c   :  { %v1171_v23 = vpop.eup %1170 }
 0x47d   :  { %v559_v42 = vsel %vm221_vm1, %v1171_v23, 0.0 }
 0x47e   :  { %560 = vadd.xlane.f32.xlu2 %v559_v42 }
 0x486   :  { %684 = vmax.xlane.f32.xlu2 %v683_v53 }
 0x489   :  { %v731_v54 = vpop.permute.xlu1 %730 }
 0x48a   :  { %v736_v55 = vsel %vm292_vm2, %v731_v54, 0 }
 0x48b   :  { %745 = vmatpush.bf16.msrb.mxu0 %v736_v55 }
 0x4bf   :  { %v587_v58 = vpop.f32.mrf.mxu2 }
 0x4c7   :  { %v589_v59 = vpop.f32.mrf.mxu2 }
 0x4cf   :  { %v679_v60 = vpop.f32.mrf.mxu2 }
 0x4d0   :  { %v680_v61 = vadd.f32 %v679_v60, %v1536_v52 }
 0x4d2   :  { %v686_v62 = vsel %vm221_vm1, %v680_v61, -inf }
 0x4d3   :  { %687 = vmax.xlane.f32.xlu0 %v686_v62  ;;  %v1361_v62 = vmov 32.0  }
 0x4d7   :  { %v681_v63 = vpop.f32.mrf.mxu2 }
 0x4f1   :  { %v561_v44 = vpop.xlane.xlu2 %560 }
 0x4f2   :  { %1172 = vrcp.f32 %v561_v44 }
 0x4f8   :  { %v1173_v0 = vpop.eup %1172 }
 0x4f9   :  { %v565_v2 = vmul.f32 %v1173_v0, %v1171_v23  ;;  %v685_v3 = vpop.xlane.xlu2 %684  ;;  %v1143_v23 = vld [vmem:[%s1718_s8] ss:$0 sm:$0xff] }
 0x4fa   :  { %v689_v6 = vsub.f32 %v657_v51, %v685_v3  ;;  %v496_v51 = vadd.f32 %v495_v14, %v1621_v57 }
 0x4fb   :  { %v567_v33 = vadd.f32 %v565_v2, %v410_v1  ;;  %v569_v8 = vpack.c.bf16 %v565_v2, %v565_v2 }
 0x4fc   :  { %v691_v9 = vmul.f32 1.442695, %v689_v6 }
 0x4fd   :  { %1078 = vmatmul.msk.bf16.vlgmr.msrb.gmra.mxu3 %vm221_vm1, %v569_v8 }
 0x4fe   :  { %1174 = vpow2.f32 %v691_v9 }
 0x504   :  { %v1175_v52 = vpop.eup %1174 }
 0x505   :  { %v695_v27 = vsel %vm221_vm1, %v1175_v52, 0.0 }
 0x506   :  { %696 = vadd.xlane.f32.xlu2 %v695_v27 }
 0x546   :  { %v688_v10 = vpop.xlane.xlu0 %687 }
 0x547   :  { %v690_v11 = vsub.f32 %v680_v61, %v688_v10 }
 0x549   :  { %v693_v12 = vmul.f32 1.442695, %v690_v11  ;;  %v1116_v11 = vld [vmem:[#allocation8 + $0x8] sm:$0xff] }
 0x54a   :  { %877 = vmatpush.bf16.msrb.mxu2 %v1116_v11 }
 0x54b   :  { %1176 = vpow2.f32 %v693_v12 }
 0x54e   :  { %878 = vmatpush.bf16.msrb.mxu2 %v1115_v7 }
 0x551   :  { %v1177_v13 = vpop.eup %1176 }
 0x552   :  { %v698_v28 = vsel %vm221_vm1, %v1177_v13, 0.0 }
 0x553   :  { %699 = vadd.xlane.f32.xlu2 %v698_v28 }
 0x56b   :  { %709 = vrot.lane.b32.xlu2 %v1506_v20, %s1360_s23 }
 0x579   :  { %v697_v15 = vpop.xlane.xlu2 %696 }
 0x57a   :  { %1178 = vrcp.f32 %v697_v15 }
 0x580   :  { %v1179_v16 = vpop.eup %1178  ;;  %v608_v17 = vpop.f32.mrf.mxu3 }
 0x581   :  { %v703_v18 = vmul.f32 %v1179_v16, %v1175_v52  ;;  %v612_v19 = vpack.c.bf16 %v608_v17, %v587_v58 }
 0x583   :  { %v705_v21 = vadd.f32 %v703_v18, %v1612_v40  ;;  %1079 = vmatmul.msk.bf16.vlgmr.msra.gmra.mxu0 %vm221_vm1, %v612_v19  ;;  %v707_v35 = vpack.c.bf16 %v703_v18, %v703_v18  ;;  %v753_v40 = vld [vmem:[#allocation7 + $0xc] sm:$0xf] }
 0x584   :  { %v758_v41 = vsel %vm292_vm2, %v753_v40, 0 }
 0x585   :  { %v1002_v22 = vmul.f32 0.25, %v705_v21  ;;  %767 = vmatpush.bf16.msrb.mxu1 %v758_v41 }
 0x587   :  { %1004 = vst.msk [vmem:[#allocation11] sm:$0xff] %vm221_vm1, %v1002_v22 }
 0x588   :  { %v610_v24 = vpop.f32.mrf.mxu3 }
 0x5c6   :  { %v700_v25 = vpop.xlane.xlu2 %699 }
 0x5c7   :  { %1180 = vrcp.f32 %v700_v25 }
 0x5c8   :  { %1182 = vrcp.f32 %v1361_v62 }
 0x5cd   :  { %v1181_v26 = vpop.eup %1180 }
 0x5ce   :  { %v704_v20 = vmul.f32 %v1181_v26, %v1177_v13  ;;  %v710_v29 = vpop.permute.xlu2 %709  ;;  %v1183_v63 = vpop.eup %1182 }
 0x5cf   :  { %v715_v30 = vsel %vm292_vm2, %v710_v29, 0  ;;  %v791_v44 = vmul.f32 32.0, %v1183_v63  ;;  %vm795_vm3 = vweird.f32 %v1183_v63 }
 0x5d0   :  { %v706_v32 = vadd.f32 %v704_v20, %v567_v33  ;;  %v708_v34 = vpack.c.bf16 %v704_v20, %v704_v20  ;;  %724 = vmatpush.bf16.msra.mxu3 %v715_v30 }
 0x5d2   :  { %v1003_v36 = vmul.f32 0.25, %v706_v32  ;;  %1083 = vmatmul.msk.bf16.vlgmr.msrb.gmra.mxu0 %vm221_vm1, %v708_v34  ;;  %v1144_v34 = vld [vmem:[%s1723_s13] ss:$0 sm:$0xff] }
 0x5d3   :  { %1082 = vmatmul.msk.bf16.vlgmr.msra.gmra.mxu3 %vm221_vm1, %v707_v35 }
 0x5d4   :  { %1005 = vst.msk [vmem:[#allocation11 + $0x8] sm:$0xff] %vm221_vm1, %v1003_v36 }
 0x600   :  { %v630_v38 = vpop.f32.mrf.mxu0 }
 0x601   :  { %v635_v39 = vadd.f32 %v630_v38, %v494_v37  ;;  %v1145_v38 = vld [vmem:[%s1724_s14] ss:$0 sm:$0xff] }
 0x608   :  { %v632_v43 = vpop.f32.mrf.mxu0 }
 0x609   :  { %v636_v54 = vadd.f32 %v632_v43, %v496_v51 }
 0x64f   :  { %v747_v45 = vpop.f32.mrf.mxu0 }
 0x656   :  { %v726_v46 = vpop.f32.mrf.mxu3 }
 0x657   :  { %v751_v47 = vpack.c.bf16 %v747_v45, %v726_v46  ;;  %v749_v31 = vpop.f32.mrf.mxu0 }
 0x658   :  { %v1119_v31 = vld [vmem:[%s1721_s11 + $0x10] sm:$0xff] }
 0x659   :  { %1084 = vmatmul.msk.bf16.vlgmr.msrb.gmra.mxu1 %vm221_vm1, %v751_v47  ;;  %v1120_v47 = vld [vmem:[%s1721_s11 + $0x18] sm:$0xff] }
 0x65a   :  { %932 = vmatpush.bf16.msrb.mxu3 %v1120_v47 }
 0x65e   :  { %v728_v48 = vpop.f32.mrf.mxu3  ;;  %933 = vmatpush.bf16.msrb.mxu3 %v1119_v31 }
 0x65f   :  { %v1118_v48 = vld [vmem:[%s1721_s11 + $0x8] sm:$0xff] }
 0x662   :  { %934 = vmatpush.bf16.msrb.mxu3 %v1118_v48 }
 0x6d6   :  { %v769_v49 = vpop.f32.mrf.mxu1 }
 0x6d7   :  { %v774_v50 = vadd.f32 %v769_v49, %v635_v39  ;;  %v1117_v49 = vld [vmem:[%s1721_s11] sm:$0xff] }
 0x6d8   :  { %935 = vmatpush.bf16.msrb.mxu3 %v1117_v49 }
 0x6d9   :  { %v776_v42 = vadd.f32 %v774_v50, %v1482_v4  ;;  %v792_v4 = vsub.f32 1.0, %v791_v44 }
 0x6db   :  { %v782_v53 = vadd.f32 %v1143_v23, %v776_v42  ;;  %v793_v0 = vmul.f32 %v1183_v63, %v792_v4 }
 0x6dd   :  { %v784_v55 = vsel %vm150_vm0, %v782_v53, 0.0  ;;  %v794_v57 = vadd.f32 %v1183_v63, %v793_v0 }
 0x6de   :  { %785 = vadd.xlane.f32.xlu0 %v784_v55  ;;  %v771_v56 = vpop.f32.mrf.mxu1 }
 0x6df   :  { %v775_v58 = vadd.f32 %v771_v56, %v636_v54  ;;  %v1649_v1 = vsel %vm795_vm3, %v1183_v63, %v794_v57 }
 0x6e1   :  { %v777_v59 = vadd.f32 %v775_v58, %v1487_v5  ;;  %v1147_v58 = vld [vmem:[%s1722_s12] ss:$0 sm:$0xff] }
 0x6e3   :  { %v783_v60 = vadd.f32 %v1143_v23, %v777_v59  ;;  %v1146_v23 = vld [vmem:[%s1720_s10] ss:$0 sm:$0xff]  ;;  %s1362_s10 = smov [#allocation11]  }
 0x6e4   :  { %s1023_s11 = sshll.u32 %s1362_s10, 4  ;;  %s1024_s11 = int_to_ptr.vmem [resolvable:$true] %s1023_s11 }
 0x6e5   :  { %v787_v61 = vsel %vm150_vm0, %v783_v60, 0.0  ;;  %1031 = dma.vmem_to_hbm [thread:$0]  %s1024_s11, 256, %s1026_s6, [#allocation12], %s1363_s29, %s1363_s29, %s1364_s0  }
 0x6e6   :  { %788 = vadd.xlane.f32.xlu2 %v787_v61 }
 0x751   :  { %v786_v2 = vpop.xlane.xlu0 %785 }
 0x752   :  { %v797_v3 = vmul.f32 %v1649_v1, %v786_v2 }
 0x754   :  { %v799_v6 = vsub.f32 %v782_v53, %v797_v3 }
 0x756   :  { %v801_v33 = vmul.f32 %v799_v6, %v799_v6 }
 0x758   :  { %v803_v5 = vsel %vm150_vm0, %v801_v33, 0.0 }
 0x759   :  { %804 = vadd.xlane.f32.xlu0 %v803_v5  ;;  %v789_v8 = vpop.xlane.xlu2 %788 }
 0x75a   :  { %v798_v9 = vmul.f32 %v1649_v1, %v789_v8 }
 0x75c   :  { %v800_v52 = vsub.f32 %v783_v60, %v798_v9 }
 0x75e   :  { %v802_v27 = vmul.f32 %v800_v52, %v800_v52 }
 0x760   :  { %v806_v10 = vsel %vm150_vm0, %v802_v27, 0.0 }
 0x761   :  { %807 = vadd.xlane.f32.xlu1 %v806_v10 }
 0x7cc   :  { %v805_v12 = vpop.xlane.xlu0 %804 }
 0x7cd   :  { %v809_v13 = vmul.f32 %v805_v12, %v1649_v1 }
 0x7cf   :  { %v811_v28 = vadd.f32 1e-05, %v809_v13 }
 0x7d1   :  { %1184 = vrsqrt.f32 %v811_v28  ;;  %vm819_vm5 = vweird.f32 %v811_v28 }
 0x7d4   :  { %v808_v14 = vpop.xlane.xlu1 %807 }
 0x7d5   :  { %v810_v15 = vmul.f32 %v808_v14, %v1649_v1 }
 0x7d7   :  { %v1185_v16 = vpop.eup %1184  ;;  %v812_v17 = vadd.f32 1e-05, %v810_v15 }
 0x7d8   :  { %v814_v18 = vmul.f32 %v1185_v16, %v811_v28  ;;  %vm820_vm4 = vweird.f32 %v1185_v16 }
 0x7d9   :  { %1186 = vrsqrt.f32 %v812_v17  ;;  %vm821_vm6 = vmor %vm819_vm5, %vm820_vm4  ;;  %vm829_vm8 = vweird.f32 %v812_v17 }
 0x7da   :  { %v815_v19 = vmul.f32 %v1185_v16, %v814_v18 }
 0x7dc   :  { %v816_v21 = vmul.f32 0.5, %v815_v19 }
 0x7de   :  { %v817_v22 = vsub.f32 1.5, %v816_v21 }
 0x7df   :  { %v1187_v24 = vpop.eup %1186 }
 0x7e0   :  { %v818_v25 = vmul.f32 %v1185_v16, %v817_v22  ;;  %v824_v26 = vmul.f32 %v1187_v24, %v812_v17  ;;  %vm830_vm7 = vweird.f32 %v1187_v24 }
 0x7e1   :  { %vm831_vm9 = vmor %vm829_vm8, %vm830_vm7 }
 0x7e2   :  { %v825_v20 = vmul.f32 %v1187_v24, %v824_v26  ;;  %v822_v29 = vsel %vm821_vm6, %v1185_v16, %v818_v25 }
 0x7e3   :  { %v833_v35 = vmul.f32 %v822_v29, %v799_v6 }
 0x7e4   :  { %v826_v30 = vmul.f32 0.5, %v825_v20 }
 0x7e5   :  { %v839_v39 = vmul.f32 %v1144_v34, %v833_v35 }
 0x7e6   :  { %v827_v32 = vsub.f32 1.5, %v826_v30 }
 0x7e7   :  { %v845_v43 = vadd.f32 %v1145_v38, %v839_v39 }
 0x7e8   :  { %v828_v36 = vmul.f32 %v1187_v24, %v827_v32 }
 0x7ea   :  { %v832_v37 = vsel %vm831_vm9, %v1187_v24, %v828_v36  ;;  %v1148_v24 = vld [vmem:[%s1725_s15] ss:$0 sm:$0xff]  ;;  %s1365_s15 = smov [#allocation10]  }
 0x7eb   :  { %v834_v40 = vmul.f32 %v832_v37, %v800_v52  ;;  %s1010_s24 = sshll.u32 %s1365_s15, 4  ;;  %s1011_s24 = int_to_ptr.vmem [resolvable:$true] %s1010_s24 }
 0x7ed   :  { %v840_v41 = vmul.f32 %v1144_v34, %v834_v40 }
 0x7ef   :  { %v846_v45 = vadd.f32 %v1145_v38, %v840_v41 }
 0x7f1   :  { %v847_v46 = vpack.c.bf16 %v846_v45, %v845_v43 }
 0x7f3   :  { %1093 = vmatmul.msk.bf16.vlgmr.msrb.gmra.mxu2 %vm150_vm0, %v847_v46 }
 0x876   :  { %v880_v50 = vpop.f32.mrf.mxu2 }
 0x877   :  { %v881_v42 = vadd.f32 %v1146_v23, %v880_v50 }
 0x879   :  { %v885_v54 = vmax.f32 %v881_v42, 0.0 }
 0x87e   :  { %v882_v51 = vpop.f32.mrf.mxu2 }
 0x87f   :  { %v883_v53 = vadd.f32 %v1146_v23, %v882_v51 }
 0x881   :  { %v886_v55 = vmax.f32 %v883_v53, 0.0 }
 0x883   :  { %v887_v56 = vpack.c.bf16 %v886_v55, %v885_v54 }
 0x885   :  { %1110 = vmatmul.msk.bf16.vlgmr.msrb.gmra.mxu3 %vm924_vm10, %v887_v56 }
 0x908   :  { %v937_v59 = vpop.f32.mrf.mxu3 }
 0x909   :  { %v938_v60 = vadd.f32 %v1147_v58, %v937_v59 }
 0x90b   :  { %v942_v61 = vadd.f32 %v938_v60, %v845_v43 }
 0x90d   :  { %v944_v62 = vsel %vm150_vm0, %v942_v61, 0.0 }
 0x90e   :  { %945 = vadd.xlane.f32.xlu0 %v944_v62 }
 0x910   :  { %v939_v63 = vpop.f32.mrf.mxu3 }
 0x911   :  { %v940_v44 = vadd.f32 %v1147_v58, %v939_v63 }
 0x913   :  { %v943_v4 = vadd.f32 %v940_v44, %v846_v45 }
 0x915   :  { %v947_v0 = vsel %vm150_vm0, %v943_v4, 0.0 }
 0x916   :  { %948 = vadd.xlane.f32.xlu0 %v947_v0 }
 0x981   :  { %v946_v57 = vpop.xlane.xlu0 %945 }
 0x982   :  { %v950_v2 = vmul.f32 %v946_v57, %v1649_v1 }
 0x984   :  { %v952_v3 = vsub.f32 %v942_v61, %v950_v2 }
 0x986   :  { %v954_v6 = vmul.f32 %v952_v3, %v952_v3 }
 0x988   :  { %v956_v33 = vsel %vm150_vm0, %v954_v6, 0.0 }
 0x989   :  { %957 = vadd.xlane.f32.xlu0 %v956_v33  ;;  %v949_v5 = vpop.xlane.xlu0 %948 }
 0x98a   :  { %v951_v8 = vmul.f32 %v949_v5, %v1649_v1 }
 0x98c   :  { %v953_v9 = vsub.f32 %v943_v4, %v951_v8 }
 0x98e   :  { %v955_v52 = vmul.f32 %v953_v9, %v953_v9 }
 0x990   :  { %v959_v27 = vsel %vm150_vm0, %v955_v52, 0.0 }
 0x991   :  { %960 = vadd.xlane.f32.xlu0 %v959_v27 }
 0x9fc   :  { %v958_v10 = vpop.xlane.xlu0 %957 }
 0x9fd   :  { %v962_v11 = vmul.f32 %v958_v10, %v1649_v1 }
 0x9ff   :  { %v964_v12 = vadd.f32 1e-05, %v962_v11 }
 0xa01   :  { %1188 = vrsqrt.f32 %v964_v12  ;;  %vm972_vm12 = vweird.f32 %v964_v12 }
 0xa04   :  { %v961_v13 = vpop.xlane.xlu0 %960 }
 0xa05   :  { %v963_v28 = vmul.f32 %v961_v13, %v1649_v1  ;;  %v1149_v1 = vld [vmem:[%s1726_s16] ss:$0 sm:$0xff] }
 0xa07   :  { %v1189_v7 = vpop.eup %1188  ;;  %v965_v14 = vadd.f32 1e-05, %v963_v28 }
 0xa08   :  { %v967_v15 = vmul.f32 %v1189_v7, %v964_v12  ;;  %vm973_vm11 = vweird.f32 %v1189_v7 }
 0xa09   :  { %1190 = vrsqrt.f32 %v965_v14  ;;  %vm974_vm13 = vmor %vm972_vm12, %vm973_vm11  ;;  %vm982_vm15 = vweird.f32 %v965_v14 }
 0xa0a   :  { %v968_v16 = vmul.f32 %v1189_v7, %v967_v15 }
 0xa0c   :  { %v969_v17 = vmul.f32 0.5, %v968_v16 }
 0xa0e   :  { %v970_v18 = vsub.f32 1.5, %v969_v17 }
 0xa0f   :  { %v1191_v19 = vpop.eup %1190 }
 0xa10   :  { %v971_v21 = vmul.f32 %v1189_v7, %v970_v18  ;;  %v977_v22 = vmul.f32 %v1191_v19, %v965_v14  ;;  %vm983_vm14 = vweird.f32 %v1191_v19 }
 0xa11   :  { %vm984_vm1 = vmor %vm982_vm15, %vm983_vm14 }
 0xa12   :  { %v975_v25 = vsel %vm974_vm13, %v1189_v7, %v971_v21  ;;  %v978_v26 = vmul.f32 %v1191_v19, %v977_v22 }
 0xa13   :  { %v986_v20 = vmul.f32 %v975_v25, %v952_v3 }
 0xa14   :  { %v979_v29 = vmul.f32 0.5, %v978_v26 }
 0xa15   :  { %v992_v30 = vmul.f32 %v1148_v24, %v986_v20 }
 0xa16   :  { %v980_v32 = vsub.f32 1.5, %v979_v29 }
 0xa17   :  { %v998_v34 = vadd.f32 %v1149_v1, %v992_v30 }
 0xa18   :  { %v981_v35 = vmul.f32 %v1191_v19, %v980_v32 }
 0xa19   :  { %1000 = vst.msk [vmem:[#allocation10] sm:$0xff] %vm150_vm0, %v998_v34 }
 0xa1a   :  { %v985_v36 = vsel %vm984_vm1, %v1191_v19, %v981_v35 }
 0xa1b   :  { %v987_v37 = vmul.f32 %v985_v36, %v953_v9 }
 0xa1d   :  { %v993_v38 = vmul.f32 %v1148_v24, %v987_v37 }
 0xa1f   :  { %v999_v39 = vadd.f32 %v1149_v1, %v993_v38 }
 0xa21   :  { %1001 = vst.msk [vmem:[#allocation10 + $0x8] sm:$0xff] %vm150_vm0, %v999_v39 }
 0xa22   :  { %1018 = dma.vmem_to_hbm [thread:$0]  %s1011_s24, 256, %s1013_s25, [#allocation4], %s1363_s29, %s1363_s29, %s1364_s0  }
 0xa23   :  { %1342 = dma.done.wait [#allocation4], 256  }
 0xa24   :  { %1343 = vsyncadd [#allocation4], 4294967040 }
 0xa25   :  { %1344 = dma.done.wait [#allocation12], 256  }
 0xa26   :  { %1345 = vsyncadd [#allocation12], 4294967040 }
 0xa27   :  { %1040 = vsyncpa [#allocation3], 1 }
 0xa28   :  { %1041 = vsyncpa [#allocation6], 1 }
 0xa29   :  { %1042 = vsyncpa [#allocation9], 1 }
 0xa2a   :  { %1043 = vsyncpa [#allocation4], 1 }
 0xa2b   :  { %1044 = vsyncpa [#allocation12], 1 }

</bundles_post_ra>
